<compile_context>
chip_gen: v6e
topology: v6e:2x2x1
jax: 0.10.0
libtpu: 0.0.40
codegen_flags: <defaults>
</compile_context>

<pallas_src>
import functools
import time

import jax
import jax.numpy as jnp
from jax.experimental import pallas as pl
from jax.experimental.pallas import tpu as pltpu

Q_SCALE = 0.0472
Q_ZERO = 64.0


def _fake_quant(x):
    """torch.quantize_per_tensor(scale=0.0472, zp=64, quint8) + dequantize."""
    q = jnp.clip(jnp.round(x / Q_SCALE + Q_ZERO), 0.0, 255.0)
    return (q - Q_ZERO) * Q_SCALE


def _round_up(n, m):
    return ((n + m - 1) // m) * m


# ----------------------------------------------------------------------------
# Shared kernel: fake-quantize the input slab, one matmul on the MXU, add bias.
# Used by both the im2col conv and the linear layers.
#   x_ref: (M, K) fp32       w_ref: (K, Np) fp32 or bf16
#   b_ref: (1, Np) fp32      o_ref: (M, Np) fp32   (Np is a multiple of 128)
# ----------------------------------------------------------------------------
def _fq_matmul_kernel(x_ref, w_ref, b_ref, o_ref):
    xq = _fake_quant(x_ref[...]).astype(w_ref.dtype)
    o_ref[...] = jnp.dot(xq, w_ref[...],
                         preferred_element_type=jnp.float32) + b_ref[...]


def _fq_matmul(x2d, wk, bk):
    M, K = x2d.shape
    Np = wk.shape[1]
    return pl.pallas_call(
        _fq_matmul_kernel,
        out_shape=jax.ShapeDtypeStruct((M, Np), jnp.float32),
        grid=(1,),
        in_specs=[
            pl.BlockSpec((M, K), lambda i: (0, 0)),
            pl.BlockSpec((K, Np), lambda i: (0, 0)),
            pl.BlockSpec((1, Np), lambda i: (0, 0)),
        ],
        out_specs=pl.BlockSpec((M, Np), lambda i: (0, 0)),
        compiler_params=pltpu.CompilerParams(dimension_semantics=("arbitrary",)),
    )(x2d, wk, bk)


# ----------------------------------------------------------------------------
# Conv2d 3x3, stride 1, padding 1  (quantized-input, fp32 accumulate)
#   wk: kernel-ready weights (9*Cin, Cout_p), bk: (1, Cout_p), cout: true Cout
# ----------------------------------------------------------------------------
@functools.partial(jax.jit, static_argnames=("cout",))
def conv3x3_same(x_nchw, wk, bk, *, cout):
    B, Cin, H, W = x_nchw.shape
    x = jnp.transpose(x_nchw, (0, 2, 3, 1))                  # NHWC
    xp = jnp.pad(x, ((0, 0), (1, 1), (1, 1), (0, 0)))        # zero pad == zp pad
    # im2col: (B*H*W, 9*Cin) patch matrix (fake-quant is elementwise, so it can
    # be applied after duplication inside the kernel with identical results).
    cols = [xp[:, ky:ky + H, kx:kx + W, :] for ky in range(3) for kx in range(3)]
    patches = jnp.concatenate(cols, axis=-1).reshape(B * H * W, 9 * Cin)
    out = _fq_matmul(patches, wk, bk)                        # (B*H*W, Cout_p)
    out = out[:, :cout].reshape(B, H, W, cout)
    return jnp.transpose(out, (0, 3, 1, 2))                  # back to NCHW


def prep_conv_params(w_oihw, b):
    cout, cin = int(w_oihw.shape[0]), int(w_oihw.shape[1])
    wk = jnp.transpose(w_oihw, (2, 3, 1, 0)).reshape(9 * cin, cout)
    cout_p = _round_up(cout, 128)
    wk = jnp.pad(wk, ((0, 0), (0, cout_p - cout)))
    bk = jnp.pad(b, (0, cout_p - cout)).reshape(1, cout_p)
    return wk, bk, cout


# ----------------------------------------------------------------------------
# Linear (y = x @ W^T + b), quantized-input, bf16 weights, fp32 accumulate
#   wk: kernel-ready (Fin, Fout_p) bf16, bk: (1, Fout_p) fp32, fout: true Fout
# ----------------------------------------------------------------------------
@functools.partial(jax.jit, static_argnames=("fout",))
def linear(x, wk, bk, *, fout):
    out = _fq_matmul(x, wk, bk)
    return out[:, :fout]


def prep_linear_params(w_out_in, b):
    fout, fin = int(w_out_in.shape[0]), int(w_out_in.shape[1])
    fout_p = _round_up(fout, 128)
    wk = jnp.pad(jnp.transpose(w_out_in), ((0, 0), (0, fout_p - fout)))
    wk = wk.astype(jnp.bfloat16)   # halve the (HBM-BW-bound) weight DMA
    bk = jnp.pad(b, (0, fout_p - fout)).reshape(1, fout_p)
    return wk, bk, fout


# ----------------------------------------------------------------------------
# AdaptiveAvgPool2d((7,7)) -- flat fake-quant + mean over the pooling window.
# For the configured spec H=W=7 (kh=kw=1) this is a single elementwise pass
# over a lane-dense (1, B*C*49) slab.
# ----------------------------------------------------------------------------
def _fq_pool_kernel(x_ref, o_ref):
    K = x_ref.shape[0]
    acc = _fake_quant(x_ref[0:1, :])
    for k in range(1, K):          # static Python loop; K known at trace time
        acc = acc + _fake_quant(x_ref[k:k + 1, :])
    o_ref[...] = acc * (1.0 / K)


@jax.jit
def adaptive_avg_pool2d_7x7(x_nchw):
    B, C, H, W = x_nchw.shape
    OH = OW = 7
    # TODO(synk): general adaptive bins (non-divisible H/W) not implemented.
    assert H % OH == 0 and W % OW == 0
    kh, kw = H // OH, W // OW
    K = kh * kw
    N = B * C * OH * OW
    x = x_nchw.reshape(B, C, OH, kh, OW, kw)
    x = jnp.transpose(x, (3, 5, 0, 1, 2, 4)).reshape(K, N)
    out = pl.pallas_call(
        _fq_pool_kernel,
        out_shape=jax.ShapeDtypeStruct((1, N), jnp.float32),
        grid=(1,),
        in_specs=[pl.BlockSpec((K, N), lambda i: (0, 0))],
        out_specs=pl.BlockSpec((1, N), lambda i: (0, 0)),
        compiler_params=pltpu.CompilerParams(dimension_semantics=("arbitrary",)),
    )(x)
    return out.reshape(B, C, OH, OW)


# ----------------------------------------------------------------------------
# VGG19 per-op benchmark module (shapes scaled down: channels /8, spatial /14)
# ----------------------------------------------------------------------------
class VGG19:
    # op index -> ("conv", Cin, Cout, spatial) | ("linear", Fin, Fout) | ("pool", C, spatial)
    _CFG = {
        0:  ("conv", 3, 8, 16),
        2:  ("conv", 8, 8, 16),
        5:  ("conv", 8, 16, 8),
        7:  ("conv", 16, 16, 8),
        10: ("conv", 16, 32, 4),
        12: ("conv", 32, 32, 4),
        14: ("conv", 32, 32, 4),
        16: ("conv", 32, 32, 4),
        19: ("conv", 32, 64, 4),
        21: ("conv", 64, 64, 2),
        23: ("conv", 64, 64, 2),
        25: ("conv", 64, 64, 2),
        28: ("conv", 64, 64, 1),
        30: ("conv", 64, 64, 1),
        32: ("conv", 64, 64, 1),
        34: ("conv", 64, 64, 1),
        37: ("pool", 64, 7),
        38: ("linear", 64 * 7 * 7, 512),
        40: ("linear", 512, 512),
        42: ("linear", 512, 125),
    }

    def __init__(self, batch_size=2, key=jax.random.PRNGKey(0)):
        self.batch = batch_size
        self.specs = {}
        self.params = {}          # kernel-ready (pre-transposed / padded) params
        for idx in sorted(self._CFG):
            spec = self._CFG[idx]
            key, k1, k2 = jax.random.split(key, 3)
            kind = spec[0]
            if kind == "conv":
                cin, cout, s = spec[1], spec[2], spec[3]
                w = jax.random.normal(k1, (cout, cin, 3, 3), jnp.float32) * 0.05
                b = jax.random.normal(k2, (cout,), jnp.float32) * 0.05
                self.params[idx] = prep_conv_params(w, b)
                self.specs[idx] = ("conv", (batch_size, cin, s, s))
            elif kind == "linear":
                fin, fout = spec[1], spec[2]
                w = jax.random.normal(k1, (fout, fin), jnp.float32) * 0.05
                b = jax.random.normal(k2, (fout,), jnp.float32) * 0.05
                self.params[idx] = prep_linear_params(w, b)
                self.specs[idx] = ("linear", (batch_size, fin))
            else:  # pool
                c, s = spec[1], spec[2]
                self.params[idx] = None
                self.specs[idx] = ("pool", (batch_size, c, s, s))
        self.time = {}

    def _run(self, i, x):
        kind = self.specs[i][0]
        if kind == "conv":
            wk, bk, cout = self.params[i]
            return conv3x3_same(x, wk, bk, cout=cout)
        elif kind == "linear":
            wk, bk, fout = self.params[i]
            return linear(x, wk, bk, fout=fout)
        else:
            return adaptive_avg_pool2d_7x7(x)

    def forward(self, i):
        if i not in self.specs:
            print("no {}".format(i))
            return None
        _, shape = self.specs[i]
        # torch.rand analogue: deterministic uniform [0,1) input of shape x{i}
        x = jax.random.uniform(jax.random.PRNGKey(1000 + i), shape, jnp.float32)
        # warm up (trace + compile + 5 dispatches, mirroring the torch benchmark)
        for _ in range(5):
            jax.block_until_ready(self._run(i, x))
        start = time.perf_counter()
        out = jax.block_until_ready(self._run(i, x))
        self.time["OP{}".format(i)] = time.perf_counter() - start
        return out


if __name__ == "__main__":
    model = VGG19(batch_size=2)
    results = {}
    for i in (0, 5, 19, 37, 38, 42):
        out = model.forward(i)
        jax.block_until_ready(out)
        results[i] = out
    # basic sanity on shapes
    assert results[0].shape == (2, 8, 16, 16)
    assert results[5].shape == (2, 16, 8, 8)
    assert results[19].shape == (2, 64, 4, 4)
    assert results[37].shape == (2, 64, 7, 7)
    assert results[38].shape == (2, 512)
    assert results[42].shape == (2, 125)
    print("KERNEL_OK")
</pallas_src>

<mosaic_0001>
module attributes {stable_mosaic.version = 11 : i64} {
  func.func @_fq_matmul_kernel(%arg0: i32, %arg1: memref<512x27xf32, #tpu.memory_space<vmem>>, %arg2: memref<27x128xf32, #tpu.memory_space<vmem>>, %arg3: memref<1x128xf32, #tpu.memory_space<vmem>>, %arg4: memref<512x128xf32, #tpu.memory_space<vmem>>) attributes {dimension_semantics = [#tpu.dimension_semantics<arbitrary>], iteration_bounds = array<i64: 1>, scalar_prefetch = 0 : i64, scratch_operands = 0 : i64, tpu.core_type = #tpu.core_type<tc>, window_params = [{pipeline_mode = #tpu.pipeline_mode<synchronous>, transform_indices = @transform_0, window_bounds = array<i64: 512, 27>}, {pipeline_mode = #tpu.pipeline_mode<synchronous>, transform_indices = @transform_1, window_bounds = array<i64: 27, 128>}, {pipeline_mode = #tpu.pipeline_mode<synchronous>, transform_indices = @transform_2, window_bounds = array<i64: 1, 128>}, {pipeline_mode = #tpu.pipeline_mode<synchronous>, transform_indices = @transform_3, window_bounds = array<i64: 512, 128>}]} {
    %c0 = arith.constant 0 : index
    %c0_0 = arith.constant 0 : index
    %0 = vector.load %arg1[%c0, %c0_0] : memref<512x27xf32, #tpu.memory_space<vmem>>, vector<512x27xf32>
    %cst = arith.constant 4.720000e-02 : f32
    %1 = vector.broadcast %cst : f32 to vector<512x27xf32>
    %2 = arith.divf %0, %1 : vector<512x27xf32>
    %cst_1 = arith.constant 6.400000e+01 : f32
    %3 = vector.broadcast %cst_1 : f32 to vector<512x27xf32>
    %4 = arith.addf %2, %3 : vector<512x27xf32>
    %5 = math.roundeven %4 : vector<512x27xf32>
    %cst_2 = arith.constant 0.000000e+00 : f32
    %cst_3 = arith.constant 2.550000e+02 : f32
    %6 = vector.broadcast %cst_2 : f32 to vector<512x27xf32>
    %7 = arith.maximumf %6, %5 : vector<512x27xf32>
    %8 = vector.broadcast %cst_3 : f32 to vector<512x27xf32>
    %9 = arith.minimumf %8, %7 : vector<512x27xf32>
    %cst_4 = arith.constant 6.400000e+01 : f32
    %10 = vector.broadcast %cst_4 : f32 to vector<512x27xf32>
    %11 = arith.subf %9, %10 : vector<512x27xf32>
    %cst_5 = arith.constant 4.720000e-02 : f32
    %12 = vector.broadcast %cst_5 : f32 to vector<512x27xf32>
    %13 = arith.mulf %11, %12 : vector<512x27xf32>
    %c0_6 = arith.constant 0 : index
    %c0_7 = arith.constant 0 : index
    %14 = vector.load %arg2[%c0_6, %c0_7] : memref<27x128xf32, #tpu.memory_space<vmem>>, vector<27x128xf32>
    %cst_8 = arith.constant dense<0.000000e+00> : vector<512x128xf32>
    %15 = tpu.matmul %13, %14, %cst_8 {dimension_numbers = #tpu.dot_dimension_numbers<[1], [0], [0], [1], [0, 0, 1, 1], [], []>} : vector<512x27xf32>, vector<27x128xf32>, vector<512x128xf32> -> vector<512x128xf32>
    %c0_9 = arith.constant 0 : index
    %c0_10 = arith.constant 0 : index
    %16 = vector.load %arg3[%c0_9, %c0_10] : memref<1x128xf32, #tpu.memory_space<vmem>>, vector<1x128xf32>
    %17 = vector.broadcast %16 : vector<1x128xf32> to vector<512x128xf32>
    %18 = arith.addf %15, %17 : vector<512x128xf32>
    %c0_11 = arith.constant 0 : index
    %c0_12 = arith.constant 0 : index
    %19 = vector.load %arg4[%c0_11, %c0_12] : memref<512x128xf32, #tpu.memory_space<vmem>>, vector<512x128xf32>
    tpu.vector_store %arg4[%c0_11, %c0_12], %18 {strides = array<i32>} : memref<512x128xf32, #tpu.memory_space<vmem>>, vector<512x128xf32>,
    return
  }
  func.func @transform_0(%arg0: i32) -> (i32, i32) {
    %c0_i32 = arith.constant 0 : i32
    %c0_i32_0 = arith.constant 0 : i32
    %c0_i32_1 = arith.constant 0 : i32
    return %c0_i32, %c0_i32_0 : i32, i32
  }
  func.func @transform_1(%arg0: i32) -> (i32, i32) {
    %c0_i32 = arith.constant 0 : i32
    %c0_i32_0 = arith.constant 0 : i32
    %c0_i32_1 = arith.constant 0 : i32
    return %c0_i32, %c0_i32_0 : i32, i32
  }
  func.func @transform_2(%arg0: i32) -> (i32, i32) {
    %c0_i32 = arith.constant 0 : i32
    %c0_i32_0 = arith.constant 0 : i32
    %c0_i32_1 = arith.constant 0 : i32
    return %c0_i32, %c0_i32_0 : i32, i32
  }
  func.func @transform_3(%arg0: i32) -> (i32, i32) {
    %c0_i32 = arith.constant 0 : i32
    %c0_i32_0 = arith.constant 0 : i32
    %c0_i32_1 = arith.constant 0 : i32
    return %c0_i32, %c0_i32_0 : i32, i32
  }
}

</mosaic_0001>

<bundles_post_ra>
// kernel: conv3x3_same.1
= control target key start
LH: loop header
LB: loop body
LE: loop exit
PB: predicated region body
PF: predicated region fallthrough
CT: control target
= control target key end

     0   :  { %vm731_vm0 = vcmask 1042432   ;;  %vm538_vm4 = vcmask 220160   ;;  %s2949_s1 = inlined_call_operand.vmem [shape: f32[27,128], index: 1, kind: input, shape index: {}]   ;;  %s2950_s0 = inlined_call_operand.vmem [shape: f32[512,27], index: 0, kind: input, shape index: {}]   ;;  %s2951_s2 = inlined_call_operand.vmem [shape: f32[1,128], index: 2, kind: input, shape index: {}]   ;;  %s2952_s3 = inlined_call_operand.vmem [shape: f32[512,128], index: 3, kind: output, shape index: {}]  }
   0x1   :  { %v530_v0 = vld [vmem:[%s2949_s1 + $0x18] sm:$0x7]  ;;  %v529_v1 = vld [vmem:[%s2949_s1 + $0x10] sm:$0xff]  ;;  %v528_v2 = vld [vmem:[%s2949_s1 + $0x8] sm:$0xff] }
   0x2   :  { %1386 = vmatprep.subr.msk.mxu0 %vm731_vm0, %v530_v0  ;;  %1490 = vmatprep.subr.msk.mxu1 %vm731_vm0, %v530_v0  ;;  %v14_v3 = vld [vmem:[%s2950_s0] sm:$0xff]  ;;  %v15_v7 = vld [vmem:[%s2950_s0 + $0x8] sm:$0xff]  ;;  %v16_v11 = vld [vmem:[%s2950_s0 + $0x10] sm:$0xff] }
   0x3   :  { %v46_v4 = vld [vmem:[%s2950_s0 + $0x100] sm:$0xff]  ;;  %1387 = vmatpush3.msk.msra.mxu0 %vm731_vm0, %v530_v0  ;;  %1494 = vmatpush3.msk.msra.mxu1 %vm731_vm0, %v530_v0  ;;  %v79_v5 = vmul.f32 21.18644, %v14_v3  ;;  %v47_v8 = vld [vmem:[%s2950_s0 + $0x108] sm:$0xff]  ;;  %v80_v9 = vmul.f32 21.18644, %v15_v7 }
   0x4   :  { %v111_v6 = vmul.f32 21.18644, %v46_v4  ;;  %1388 = vmatprep.subr.mxu0 %v529_v1  ;;  %1491 = vmatprep.subr.mxu1 %v529_v1  ;;  %v112_v10 = vmul.f32 21.18644, %v47_v8  ;;  %v48_v12 = vld [vmem:[%s2950_s0 + $0x110] sm:$0xff]  ;;  %v527_v13 = vld [vmem:[%s2949_s1] sm:$0xff] }
   0x5   :  { %1389 = vmatpush3.msra.mxu0 %v529_v1  ;;  %1495 = vmatpush3.msra.mxu1 %v529_v1  ;;  %v143_v14 = vadd.f32 64.0, %v79_v5  ;;  %v144_v16 = vadd.f32 64.0, %v80_v9  ;;  %v81_v17 = vmul.f32 21.18644, %v16_v11  ;;  %v113_v18 = vmul.f32 21.18644, %v48_v12 }
   0x6   :  { %v175_v15 = vadd.f32 64.0, %v111_v6  ;;  %1390 = vmatprep.subr.mxu0 %v528_v2  ;;  %1492 = vmatprep.subr.mxu1 %v528_v2  ;;  %v176_v22 = vadd.f32 64.0, %v112_v10  ;;  %v17_v55 = vld [vmem:[%s2950_s0 + $0x18] sm:$0xff]  ;;  %v19_v59 = vld [vmem:[%s2950_s0 + $0x28] sm:$0xff] }
   0x7   :  { %1391 = vmatpush3.msra.mxu0 %v528_v2  ;;  %1496 = vmatpush3.msra.mxu1 %v528_v2  ;;  %v1498_v19 = vand.u32 2147483647, %v143_v14  ;;  %v1500_v20 = vcvt.f32.s32 %v143_v14  ;;  %v1503_v23 = vand.u32 2147483648, %v143_v14  ;;  %v1506_v25 = vand.u32 2147483647, %v144_v16  ;;  %v49_v4 = vld [vmem:[%s2950_s0 + $0x118] sm:$0xff] }
   0x8   :  { %v1754_v21 = vand.u32 2147483647, %v175_v15  ;;  %1392 = vmatprep.subr.mxu0 %v527_v13  ;;  %1493 = vmatprep.subr.mxu1 %v527_v13  ;;  %v1756_v24 = vcvt.f32.s32 %v175_v15  ;;  %v1508_v26 = vcvt.f32.s32 %v144_v16  ;;  %v1759_v30 = vand.u32 2147483648, %v175_v15 }
   0x9   :  { %1393 = vmatpush3.msra.mxu0 %v527_v13  ;;  %1497 = vmatpush3.msra.mxu1 %v527_v13  ;;  %vm2060_vm1 = vcmp.lt.f32.partialorder %v1498_v19, 8388608.0  ;;  %v1501_v28 = vcvt.s32.f32 %v1500_v20  ;;  %v1511_v33 = vand.u32 2147483648, %v144_v16  ;;  %v1762_v34 = vand.u32 2147483647, %v176_v22 }
   0xa   :  { %vm2064_vm2 = vcmp.lt.f32.partialorder %v1754_v21, 8388608.0  ;;  %v1757_v31 = vcvt.s32.f32 %v1756_v24  ;;  %v1509_v32 = vcvt.s32.f32 %v1508_v26  ;;  %vm2068_vm3 = vcmp.lt.f32.partialorder %v1506_v25, 8388608.0  ;;  %v50_v26 = vld [vmem:[%s2950_s0 + $0x120] sm:$0xff] }
   0xb   :  { %v1502_v35 = vand.u32 2147483647, %v1501_v28  ;;  %v1764_v37 = vcvt.f32.s32 %v176_v22  ;;  %v145_v38 = vadd.f32 64.0, %v81_v17  ;;  %v1767_v41 = vand.u32 2147483648, %v176_v22  ;;  %v18_v17 = vld [vmem:[%s2950_s0 + $0x20] sm:$0xff] }
   0xc   :  { %v1758_v39 = vand.u32 2147483647, %v1757_v31  ;;  %v1510_v40 = vand.u32 2147483647, %v1509_v32  ;;  %v2072_v42 = vadd.f32 64.0, %v113_v18  ;;  %vm2074_vm5 = vcmp.lt.f32.partialorder %v1762_v34, 8388608.0 }
   0xd   :  { %v1504_v43 = vor.u32 %v1503_v23, %v1502_v35  ;;  %v1765_v44 = vcvt.s32.f32 %v1764_v37  ;;  %v1514_v45 = vand.u32 2147483647, %v145_v38  ;;  %v1516_v46 = vcvt.f32.s32 %v145_v38 }
   0xe   :  { %v1760_v47 = vor.u32 %v1759_v30, %v1758_v39  ;;  %v1512_v48 = vor.u32 %v1511_v33, %v1510_v40  ;;  %v1519_v50 = vand.u32 2147483648, %v145_v38  ;;  %v1770_v54 = vand.u32 2147483647, %v2072_v42 }
   0xf   :  { %v1505_v51 = vsel %vm2060_vm1, %v1504_v43, %v143_v14  ;;  %v1766_v52 = vand.u32 2147483647, %v1765_v44  ;;  %v1517_v53 = vcvt.s32.f32 %v1516_v46  ;;  %vm2088_vm6 = vcmp.lt.f32.partialorder %v1514_v45, 8388608.0 }
  0x10   :  { %v271_v56 = vmax.f32 %v1505_v51, 0.0  ;;  %v1761_v57 = vsel %vm2064_vm2, %v1760_v47, %v175_v15  ;;  %v1513_v58 = vsel %vm2068_vm3, %v1512_v48, %v144_v16  ;;  %v1772_v1 = vcvt.f32.s32 %v2072_v42 }
  0x11   :  { %v303_v60 = vmax.f32 %v1761_v57, 0.0  ;;  %v272_v61 = vmax.f32 %v1513_v58, 0.0  ;;  %v1768_v62 = vor.u32 %v1767_v41, %v1766_v52  ;;  %v1518_v63 = vand.u32 2147483647, %v1517_v53 }
  0x12   :  { %v335_v0 = vmin.f32 %v271_v56, 255.0  ;;  %v1775_v2 = vand.u32 2147483648, %v2072_v42  ;;  %v82_v3 = vmul.f32 21.18644, %v17_v55  ;;  %v1773_v11 = vcvt.s32.f32 %v1772_v1  ;;  %v20_v1 = vld [vmem:[%s2950_s0 + $0x30] sm:$0xff] }
  0x13   :  { %v367_v5 = vmin.f32 %v303_v60, 255.0  ;;  %v336_v6 = vmin.f32 %v272_v61, 255.0  ;;  %v1769_v7 = vsel %vm2074_vm5, %v1768_v62, %v176_v22  ;;  %v1520_v8 = vor.u32 %v1519_v50, %v1518_v63 }
  0x14   :  { %v1188_v9 = vadd.f32 -64.0, %v335_v0  ;;  %v304_v10 = vmax.f32 %v1769_v7, 0.0  ;;  %v146_v12 = vadd.f32 64.0, %v82_v3  ;;  %v114_v16 = vmul.f32 21.18644, %v49_v4  ;;  %v51_v0 = vld [vmem:[%s2950_s0 + $0x128] sm:$0xff] }
  0x15   :  { %v1220_v13 = vadd.f32 -64.0, %v367_v5  ;;  %v1189_v14 = vadd.f32 -64.0, %v336_v6  ;;  %v1521_v15 = vsel %vm2088_vm6, %v1520_v8, %v145_v38  ;;  %v1774_v21 = vand.u32 2147483647, %v1773_v11 }
  0x16   :  { %v463_v18 = vmul.f32 0.0472, %v1188_v9  ;;  %v368_v19 = vmin.f32 %v304_v10, 255.0  ;;  %v273_v20 = vmax.f32 %v1521_v15, 0.0  ;;  %vm2104_vm7 = vcmp.lt.f32.partialorder %v1770_v54, 8388608.0 }
  0x17   :  { %v495_v22 = vmul.f32 0.0472, %v1220_v13  ;;  %v464_v23 = vmul.f32 0.0472, %v1189_v14  ;;  %v1524_v25 = vcvt.f32.s32 %v146_v12  ;;  %v1776_v29 = vor.u32 %v1775_v2, %v1774_v21 }
  0x18   :  { %1394 = vmatprep.mubr.msk.f32.mxu0 %vm538_vm4, %v463_v18  ;;  %v1221_v27 = vadd.f32 -64.0, %v368_v19  ;;  %v337_v28 = vmin.f32 %v273_v20, 255.0  ;;  %v1522_v30 = vand.u32 2147483647, %v146_v12  ;;  %v1527_v32 = vand.u32 2147483648, %v146_v12  ;;  %v52_v18 = vld [vmem:[%s2950_s0 + $0x130] sm:$0xff] }
  0x19   :  { %1442 = vmatprep.mubr.msk.f32.mxu1 %vm538_vm4, %v495_v22  ;;  %1395 = vmatmul.mubr.msk.f32.vlgmr.msra.gmra.mxu0 %vm538_vm4, %v464_v23  ;;  %v1525_v31 = vcvt.s32.f32 %v1524_v25  ;;  %v178_v33 = vadd.f32 64.0, %v114_v16  ;;  %v83_v34 = vmul.f32 21.18644, %v18_v17  ;;  %v1777_v37 = vsel %vm2104_vm7, %v1776_v29, %v2072_v42 }
  0x1a   :  { %v496_v35 = vmul.f32 0.0472, %v1221_v27  ;;  %v1190_v36 = vadd.f32 -64.0, %v337_v28  ;;  %v115_v38 = vmul.f32 21.18644, %v50_v26  ;;  %v305_v39 = vmax.f32 %v1777_v37, 0.0 }
  0x1b   :  { %v1526_v40 = vand.u32 2147483647, %v1525_v31  ;;  %v1778_v41 = vand.u32 2147483647, %v178_v33  ;;  %v1780_v43 = vcvt.f32.s32 %v178_v33  ;;  %vm2118_vm8 = vcmp.lt.f32.partialorder %v1522_v30, 8388608.0 }
  0x1c   :  { %1443 = vmatmul.mubr.msk.f32.vlgmr.msra.gmra.mxu1 %vm538_vm4, %v496_v35  ;;  %v465_v44 = vmul.f32 0.0472, %v1190_v36  ;;  %v147_v46 = vadd.f32 64.0, %v83_v34  ;;  %v179_v47 = vadd.f32 64.0, %v115_v38  ;;  %v369_v48 = vmin.f32 %v305_v39, 255.0 }
  0x1d   :  { %v1528_v49 = vor.u32 %v1527_v32, %v1526_v40  ;;  %v1781_v50 = vcvt.s32.f32 %v1780_v43  ;;  %v1783_v51 = vand.u32 2147483648, %v178_v33  ;;  %vm2123_vm9 = vcmp.lt.f32.partialorder %v1778_v41, 8388608.0 }
  0x1e   :  { %1397 = vmatprep.mubr.msk.f32.mxu0 %vm538_vm4, %v465_v44  ;;  %v1530_v52 = vand.u32 2147483647, %v147_v46  ;;  %v1532_v53 = vcvt.f32.s32 %v147_v46  ;;  %v1786_v54 = vand.u32 2147483647, %v179_v47  ;;  %v1222_v55 = vadd.f32 -64.0, %v369_v48 }
  0x1f   :  { %v1529_v56 = vsel %vm2118_vm8, %v1528_v49, %v146_v12  ;;  %v1782_v57 = vand.u32 2147483647, %v1781_v50  ;;  %v1788_v58 = vcvt.f32.s32 %v179_v47  ;;  %v1535_v63 = vand.u32 2147483648, %v147_v46 }
  0x20   :  { %v274_v60 = vmax.f32 %v1529_v56, 0.0  ;;  %vm2132_vm10 = vcmp.lt.f32.partialorder %v1530_v52, 8388608.0  ;;  %v1533_v62 = vcvt.s32.f32 %v1532_v53  ;;  %v497_v2 = vmul.f32 0.0472, %v1222_v55  ;;  %v53_v55 = vld [vmem:[%s2950_s0 + $0x138] sm:$0xff] }
  0x21   :  { %v1784_v3 = vor.u32 %v1783_v51, %v1782_v57  ;;  %v1789_v4 = vcvt.s32.f32 %v1788_v58  ;;  %v1791_v5 = vand.u32 2147483648, %v179_v47  ;;  %vm2142_vm11 = vcmp.lt.f32.partialorder %v1786_v54, 8388608.0  ;;  %v21_v51 = vld [vmem:[%s2950_s0 + $0x38] sm:$0xff] }
  0x22   :  { %v338_v6 = vmin.f32 %v274_v60, 255.0  ;;  %v1534_v7 = vand.u32 2147483647, %v1533_v62  ;;  %v84_v9 = vmul.f32 21.18644, %v19_v59  ;;  %1445 = vmatprep.mubr.msk.f32.mxu1 %vm538_vm4, %v497_v2 }
  0x23   :  { %v1785_v10 = vsel %vm2123_vm9, %v1784_v3, %v178_v33  ;;  %v1790_v11 = vand.u32 2147483647, %v1789_v4  ;;  %v116_v12 = vmul.f32 21.18644, %v51_v0  ;;  %v85_v13 = vmul.f32 21.18644, %v20_v1 }
  0x24   :  { %v1191_v14 = vadd.f32 -64.0, %v338_v6  ;;  %v306_v15 = vmax.f32 %v1785_v10, 0.0  ;;  %v1536_v16 = vor.u32 %v1535_v63, %v1534_v7  ;;  %v148_v17 = vadd.f32 64.0, %v84_v9  ;;  %v22_v4 = vld [vmem:[%s2950_s0 + $0x40] sm:$0xff] }
  0x25   :  { %v1792_v19 = vor.u32 %v1791_v5, %v1790_v11  ;;  %v180_v20 = vadd.f32 64.0, %v116_v12  ;;  %v2152_v21 = vadd.f32 64.0, %v85_v13  ;;  %v117_v29 = vmul.f32 21.18644, %v52_v18 }
  0x26   :  { %v466_v22 = vmul.f32 0.0472, %v1191_v14  ;;  %v370_v23 = vmin.f32 %v306_v15, 255.0  ;;  %v1537_v24 = vsel %vm2132_vm10, %v1536_v16, %v147_v46  ;;  %v1538_v25 = vand.u32 2147483647, %v148_v17 }
  0x27   :  { %v275_v26 = vmax.f32 %v1537_v24, 0.0  ;;  %v1793_v27 = vsel %vm2142_vm11, %v1792_v19, %v179_v47  ;;  %v1540_v28 = vcvt.f32.s32 %v148_v17  ;;  %v1543_v32 = vand.u32 2147483648, %v148_v17 }
  0x28   :  { %1398 = vmatmul.mubr.msk.f32.gmra.mxu0 %vm538_vm4, %v466_v22  ;;  %v1223_v30 = vadd.f32 -64.0, %v370_v23  ;;  %v307_v31 = vmax.f32 %v1793_v27, 0.0  ;;  %v1794_v33 = vand.u32 2147483647, %v180_v20  ;;  %vm2159_vm12 = vcmp.lt.f32.partialorder %v1538_v25, 8388608.0 }
  0x29   :  { %v339_v34 = vmin.f32 %v275_v26, 255.0  ;;  %v1541_v36 = vcvt.s32.f32 %v1540_v28  ;;  %v1796_v37 = vcvt.f32.s32 %v180_v20  ;;  %v1799_v40 = vand.u32 2147483648, %v180_v20 }
  0x2a   :  { %v498_v38 = vmul.f32 0.0472, %v1223_v30  ;;  %v371_v39 = vmin.f32 %v307_v31, 255.0  ;;  %v1546_v41 = vand.u32 2147483647, %v2152_v21  ;;  %v1548_v46 = vcvt.f32.s32 %v2152_v21 }
  0x2b   :  { %v1192_v43 = vadd.f32 -64.0, %v339_v34  ;;  %v1542_v44 = vand.u32 2147483647, %v1541_v36  ;;  %v1797_v45 = vcvt.s32.f32 %v1796_v37  ;;  %vm2166_vm13 = vcmp.lt.f32.partialorder %v1794_v33, 8388608.0 }
  0x2c   :  { %1446 = vmatmul.mubr.msk.f32.gmra.mxu1 %vm538_vm4, %v498_v38  ;;  %v1224_v47 = vadd.f32 -64.0, %v371_v39  ;;  %v1551_v49 = vand.u32 2147483648, %v2152_v21  ;;  %v181_v50 = vadd.f32 64.0, %v117_v29  ;;  %v1549_v54 = vcvt.s32.f32 %v1548_v46 }
  0x2d   :  { %v467_v42 = vmul.f32 0.0472, %v1192_v43  ;;  %v1544_v52 = vor.u32 %v1543_v32, %v1542_v44  ;;  %v1798_v53 = vand.u32 2147483647, %v1797_v45  ;;  %vm2177_vm14 = vcmp.lt.f32.partialorder %v1546_v41, 8388608.0  ;;  %v23_v43 = vld [vmem:[%s2950_s0 + $0x48] sm:$0xff] }
  0x2e   :  { %v499_v56 = vmul.f32 0.0472, %v1224_v47  ;;  %v1802_v58 = vand.u32 2147483647, %v181_v50  ;;  %v1804_v59 = vcvt.f32.s32 %v181_v50  ;;  %v1550_v62 = vand.u32 2147483647, %v1549_v54 }
  0x2f   :  { %1400 = vmatprep.mubr.msk.f32.mxu0 %vm538_vm4, %v467_v42  ;;  %v1545_v60 = vsel %vm2159_vm12, %v1544_v52, %v148_v17  ;;  %v1800_v61 = vor.u32 %v1799_v40, %v1798_v53  ;;  %v86_v63 = vmul.f32 21.18644, %v21_v51  ;;  %v1807_v2 = vand.u32 2147483648, %v181_v50 }
  0x30   :  { %1448 = vmatprep.mubr.msk.f32.mxu1 %vm538_vm4, %v499_v56  ;;  %v276_v0 = vmax.f32 %v1545_v60, 0.0  ;;  %v1805_v1 = vcvt.s32.f32 %v1804_v59  ;;  %v118_v3 = vmul.f32 21.18644, %v53_v55  ;;  %v1552_v6 = vor.u32 %v1551_v49, %v1550_v62  ;;  %v55_v55 = vld [vmem:[%s2950_s0 + $0x148] sm:$0xff] }
  0x31   :  { %v1801_v5 = vsel %vm2166_vm13, %v1800_v61, %v180_v20  ;;  %vm2190_vm15 = vcmp.lt.f32.partialorder %v1802_v58, 8388608.0  ;;  %v150_v8 = vadd.f32 64.0, %v86_v63  ;;  %v87_v16 = vmul.f32 21.18644, %v22_v4 }
  0x32   :  { %v340_v9 = vmin.f32 %v276_v0, 255.0  ;;  %v308_v10 = vmax.f32 %v1801_v5, 0.0  ;;  %v1806_v11 = vand.u32 2147483647, %v1805_v1  ;;  %v182_v12 = vadd.f32 64.0, %v118_v3  ;;  %v24_v0 = vld [vmem:[%s2950_s0 + $0x50] sm:$0xff] }
  0x33   :  { %v1553_v13 = vsel %vm2177_vm14, %v1552_v6, %v2152_v21  ;;  %v1554_v14 = vand.u32 2147483647, %v150_v8  ;;  %v1556_v15 = vcvt.f32.s32 %v150_v8  ;;  %v1559_v23 = vand.u32 2147483648, %v150_v8  ;;  %v54_v21 = vld [vmem:[%s2950_s0 + $0x140] sm:$0xff] }
  0x34   :  { %v1193_v17 = vadd.f32 -64.0, %v340_v9  ;;  %v372_v18 = vmin.f32 %v308_v10, 255.0  ;;  %v277_v19 = vmax.f32 %v1553_v13, 0.0  ;;  %v1808_v20 = vor.u32 %v1807_v2, %v1806_v11 }
  0x35   :  { %v1557_v22 = vcvt.s32.f32 %v1556_v15  ;;  %v1810_v24 = vand.u32 2147483647, %v182_v12  ;;  %v1812_v25 = vcvt.f32.s32 %v182_v12  ;;  %vm2202_vm0 = vcmp.lt.f32.partialorder %v1554_v14, 8388608.0 }
  0x36   :  { %v468_v26 = vmul.f32 0.0472, %v1193_v17  ;;  %v1225_v27 = vadd.f32 -64.0, %v372_v18  ;;  %v341_v28 = vmin.f32 %v277_v19, 255.0  ;;  %v1809_v29 = vsel %vm2190_vm15, %v1808_v20, %v181_v50 }
  0x37   :  { %v309_v30 = vmax.f32 %v1809_v29, 0.0  ;;  %v1558_v32 = vand.u32 2147483647, %v1557_v22  ;;  %v1813_v33 = vcvt.s32.f32 %v1812_v25  ;;  %v1815_v36 = vand.u32 2147483648, %v182_v12  ;;  %v56_v22 = vld [vmem:[%s2950_s0 + $0x150] sm:$0xff] }
  0x38   :  { %1401 = vmatmul.mubr.msk.f32.gmra.mxu0 %vm538_vm4, %v468_v26  ;;  %v500_v34 = vmul.f32 0.0472, %v1225_v27  ;;  %v1194_v35 = vadd.f32 -64.0, %v341_v28  ;;  %v151_v37 = vadd.f32 64.0, %v87_v16  ;;  %v119_v41 = vmul.f32 21.18644, %v54_v21 }
  0x39   :  { %v373_v38 = vmin.f32 %v309_v30, 255.0  ;;  %v1560_v39 = vor.u32 %v1559_v23, %v1558_v32  ;;  %v1814_v40 = vand.u32 2147483647, %v1813_v33  ;;  %vm2211_vm1 = vcmp.lt.f32.partialorder %v1810_v24, 8388608.0 }
  0x3a   :  { %1449 = vmatmul.mubr.msk.f32.gmra.mxu1 %vm538_vm4, %v500_v34  ;;  %v469_v44 = vmul.f32 0.0472, %v1194_v35  ;;  %v1562_v46 = vand.u32 2147483647, %v151_v37  ;;  %v1564_v47 = vcvt.f32.s32 %v151_v37  ;;  %v183_v51 = vadd.f32 64.0, %v119_v41 }
  0x3b   :  { %v1226_v48 = vadd.f32 -64.0, %v373_v38  ;;  %v1561_v49 = vsel %vm2202_vm0, %v1560_v39, %v150_v8  ;;  %v1816_v50 = vor.u32 %v1815_v36, %v1814_v40  ;;  %v1567_v53 = vand.u32 2147483648, %v151_v37  ;;  %v58_v8 = vld [vmem:[%s2950_s0 + $0x160] sm:$0xff] }
  0x3c   :  { %1403 = vmatprep.mubr.msk.f32.mxu0 %vm538_vm4, %v469_v44  ;;  %v278_v42 = vmax.f32 %v1561_v49, 0.0  ;;  %v1565_v52 = vcvt.s32.f32 %v1564_v47  ;;  %v88_v54 = vmul.f32 21.18644, %v23_v43  ;;  %v1818_v58 = vand.u32 2147483647, %v183_v51  ;;  %v25_v43 = vld [vmem:[%s2950_s0 + $0x58] sm:$0xff] }
  0x3d   :  { %v501_v56 = vmul.f32 0.0472, %v1226_v48  ;;  %v1817_v57 = vsel %vm2211_vm1, %v1816_v50, %v182_v12  ;;  %v1820_v59 = vcvt.f32.s32 %v183_v51  ;;  %vm2223_vm2 = vcmp.lt.f32.partialorder %v1562_v46, 8388608.0 }
  0x3e   :  { %v342_v60 = vmin.f32 %v278_v42, 255.0  ;;  %v310_v61 = vmax.f32 %v1817_v57, 0.0  ;;  %v1566_v63 = vand.u32 2147483647, %v1565_v52  ;;  %v1823_v2 = vand.u32 2147483648, %v183_v51  ;;  %v57_v42 = vld [vmem:[%s2950_s0 + $0x158] sm:$0xff] }
  0x3f   :  { %1451 = vmatprep.mubr.msk.f32.mxu1 %vm538_vm4, %v501_v56  ;;  %v1821_v1 = vcvt.s32.f32 %v1820_v59  ;;  %v152_v3 = vadd.f32 64.0, %v88_v54  ;;  %v120_v4 = vmul.f32 21.18644, %v55_v55  ;;  %vm2231_vm3 = vcmp.lt.f32.partialorder %v1818_v58, 8388608.0  ;;  %v26_v52 = vld [vmem:[%s2950_s0 + $0x60] sm:$0xff] }
  0x40   :  { %v1195_v5 = vadd.f32 -64.0, %v342_v60  ;;  %v374_v6 = vmin.f32 %v310_v61, 255.0  ;;  %v1568_v7 = vor.u32 %v1567_v53, %v1566_v63  ;;  %v89_v12 = vmul.f32 21.18644, %v24_v0 }
  0x41   :  { %v1822_v9 = vand.u32 2147483647, %v1821_v1  ;;  %v1570_v10 = vand.u32 2147483647, %v152_v3  ;;  %v1572_v11 = vcvt.f32.s32 %v152_v3  ;;  %v184_v16 = vadd.f32 64.0, %v120_v4 }
  0x42   :  { %v470_v13 = vmul.f32 0.0472, %v1195_v5  ;;  %v1227_v14 = vadd.f32 -64.0, %v374_v6  ;;  %v1569_v15 = vsel %vm2223_vm2, %v1568_v7, %v151_v37  ;;  %v1575_v20 = vand.u32 2147483648, %v152_v3 }
  0x43   :  { %v279_v17 = vmax.f32 %v1569_v15, 0.0  ;;  %v1824_v18 = vor.u32 %v1823_v2, %v1822_v9  ;;  %v1573_v19 = vcvt.s32.f32 %v1572_v11  ;;  %vm2241_vm5 = vcmp.lt.f32.partialorder %v1570_v10, 8388608.0 }
  0x44   :  { %1404 = vmatmul.mubr.msk.f32.gmra.mxu0 %vm538_vm4, %v470_v13  ;;  %v502_v23 = vmul.f32 0.0472, %v1227_v14  ;;  %v1826_v25 = vand.u32 2147483647, %v184_v16  ;;  %v1828_v26 = vcvt.f32.s32 %v184_v16  ;;  %v153_v21 = vadd.f32 64.0, %v89_v12 }
  0x45   :  { %v343_v27 = vmin.f32 %v279_v17, 255.0  ;;  %v1825_v28 = vsel %vm2231_vm3, %v1824_v18, %v183_v51  ;;  %v1574_v29 = vand.u32 2147483647, %v1573_v19  ;;  %v1831_v32 = vand.u32 2147483648, %v184_v16 }
  0x46   :  { %1452 = vmatmul.mubr.msk.f32.gmra.mxu1 %vm538_vm4, %v502_v23  ;;  %v311_v30 = vmax.f32 %v1825_v28, 0.0  ;;  %v1829_v31 = vcvt.s32.f32 %v1828_v26  ;;  %v121_v33 = vmul.f32 21.18644, %v56_v22  ;;  %v1578_v36 = vand.u32 2147483647, %v153_v21 }
  0x47   :  { %v1196_v34 = vadd.f32 -64.0, %v343_v27  ;;  %v1576_v35 = vor.u32 %v1575_v20, %v1574_v29  ;;  %v1580_v37 = vcvt.f32.s32 %v153_v21  ;;  %vm2248_vm6 = vcmp.lt.f32.partialorder %v1826_v25, 8388608.0 }
  0x48   :  { %v375_v38 = vmin.f32 %v311_v30, 255.0  ;;  %v1830_v40 = vand.u32 2147483647, %v1829_v31  ;;  %v185_v41 = vadd.f32 64.0, %v121_v33  ;;  %v1583_v47 = vand.u32 2147483648, %v153_v21  ;;  %v27_v33 = vld [vmem:[%s2950_s0 + $0x68] sm:$0xff] }
  0x49   :  { %v471_v44 = vmul.f32 0.0472, %v1196_v34  ;;  %v1577_v45 = vsel %vm2241_vm5, %v1576_v35, %v152_v3  ;;  %v1581_v46 = vcvt.s32.f32 %v1580_v37  ;;  %vm2257_vm7 = vcmp.lt.f32.partialorder %v1578_v36, 8388608.0  ;;  %v59_v34 = vld [vmem:[%s2950_s0 + $0x168] sm:$0xff] }
  0x4a   :  { %v1228_v48 = vadd.f32 -64.0, %v375_v38  ;;  %v280_v49 = vmax.f32 %v1577_v45, 0.0  ;;  %v1832_v50 = vor.u32 %v1831_v32, %v1830_v40  ;;  %v1834_v54 = vand.u32 2147483647, %v185_v41 }
  0x4b   :  { %1406 = vmatprep.mubr.msk.f32.mxu0 %vm538_vm4, %v471_v44  ;;  %v1582_v53 = vand.u32 2147483647, %v1581_v46  ;;  %v1836_v55 = vcvt.f32.s32 %v185_v41  ;;  %v90_v56 = vmul.f32 21.18644, %v25_v43  ;;  %v1839_v60 = vand.u32 2147483648, %v185_v41 }
  0x4c   :  { %v503_v57 = vmul.f32 0.0472, %v1228_v48  ;;  %v344_v58 = vmin.f32 %v280_v49, 255.0  ;;  %v1833_v59 = vsel %vm2248_vm6, %v1832_v50, %v184_v16  ;;  %v122_v2 = vmul.f32 21.18644, %v57_v42 }
  0x4d   :  { %v312_v61 = vmax.f32 %v1833_v59, 0.0  ;;  %v1584_v62 = vor.u32 %v1583_v47, %v1582_v53  ;;  %v1837_v63 = vcvt.s32.f32 %v1836_v55  ;;  %v154_v0 = vadd.f32 64.0, %v90_v56 }
  0x4e   :  { %1454 = vmatprep.mubr.msk.f32.mxu1 %vm538_vm4, %v503_v57  ;;  %v1197_v1 = vadd.f32 -64.0, %v344_v58  ;;  %v91_v3 = vmul.f32 21.18644, %v26_v52  ;;  %vm2273_vm8 = vcmp.lt.f32.partialorder %v1834_v54, 8388608.0  ;;  %v186_v16 = vadd.f32 64.0, %v122_v2 }
  0x4f   :  { %v376_v4 = vmin.f32 %v312_v61, 255.0  ;;  %v1585_v5 = vsel %vm2257_vm7, %v1584_v62, %v153_v21  ;;  %v1838_v7 = vand.u32 2147483647, %v1837_v63  ;;  %v1586_v11 = vand.u32 2147483647, %v154_v0 }
  0x50   :  { %v472_v9 = vmul.f32 0.0472, %v1197_v1  ;;  %v281_v10 = vmax.f32 %v1585_v5, 0.0  ;;  %v1588_v12 = vcvt.f32.s32 %v154_v0  ;;  %v1591_v15 = vand.u32 2147483648, %v154_v0 }
  0x51   :  { %v1229_v13 = vadd.f32 -64.0, %v376_v4  ;;  %v1840_v14 = vor.u32 %v1839_v60, %v1838_v7  ;;  %v155_v19 = vadd.f32 64.0, %v91_v3  ;;  %v123_v20 = vmul.f32 21.18644, %v58_v8  ;;  %v28_v7 = vld [vmem:[%s2950_s0 + $0x70] sm:$0xff] }
  0x52   :  { %1407 = vmatmul.mubr.msk.f32.gmra.mxu0 %vm538_vm4, %v472_v9  ;;  %v345_v17 = vmin.f32 %v281_v10, 255.0  ;;  %v1589_v18 = vcvt.s32.f32 %v1588_v12  ;;  %v1842_v24 = vand.u32 2147483647, %v186_v16  ;;  %v1844_v25 = vcvt.f32.s32 %v186_v16  ;;  %v60_v12 = vld [vmem:[%s2950_s0 + $0x170] sm:$0xff] }
  0x53   :  { %v504_v22 = vmul.f32 0.0472, %v1229_v13  ;;  %v1841_v23 = vsel %vm2273_vm8, %v1840_v14, %v185_v41  ;;  %vm2283_vm9 = vcmp.lt.f32.partialorder %v1586_v11, 8388608.0  ;;  %v1847_v31 = vand.u32 2147483648, %v186_v16 }
  0x54   :  { %v1198_v26 = vadd.f32 -64.0, %v345_v17  ;;  %v313_v27 = vmax.f32 %v1841_v23, 0.0  ;;  %v1590_v29 = vand.u32 2147483647, %v1589_v18  ;;  %vm2288_vm10 = vcmp.lt.f32.partialorder %v1842_v24, 8388608.0 }
  0x55   :  { %1455 = vmatmul.mubr.msk.f32.gmra.mxu1 %vm538_vm4, %v504_v22  ;;  %v1845_v30 = vcvt.s32.f32 %v1844_v25  ;;  %v1596_v32 = vcvt.f32.s32 %v155_v19  ;;  %v1594_v38 = vand.u32 2147483647, %v155_v19  ;;  %v1599_v41 = vand.u32 2147483648, %v155_v19  ;;  %v29_v22 = vld [vmem:[%s2950_s0 + $0x78] sm:$0xff] }
  0x56   :  { %v473_v35 = vmul.f32 0.0472, %v1198_v26  ;;  %v377_v36 = vmin.f32 %v313_v27, 255.0  ;;  %v1592_v37 = vor.u32 %v1591_v15, %v1590_v29  ;;  %v187_v43 = vadd.f32 64.0, %v123_v20 }
  0x57   :  { %v1846_v39 = vand.u32 2147483647, %v1845_v30  ;;  %v1597_v40 = vcvt.s32.f32 %v1596_v32  ;;  %v92_v46 = vmul.f32 21.18644, %v27_v33  ;;  %v124_v47 = vmul.f32 21.18644, %v59_v34 }
  0x58   :  { %1409 = vmatprep.mubr.msk.f32.mxu0 %vm538_vm4, %v473_v35  ;;  %v1230_v44 = vadd.f32 -64.0, %v377_v36  ;;  %v1593_v45 = vsel %vm2283_vm9, %v1592_v37, %v154_v0  ;;  %v1850_v51 = vand.u32 2147483647, %v187_v43  ;;  %vm2301_vm11 = vcmp.lt.f32.partialorder %v1594_v38, 8388608.0 }
  0x59   :  { %v282_v48 = vmax.f32 %v1593_v45, 0.0  ;;  %v1848_v49 = vor.u32 %v1847_v31, %v1846_v39  ;;  %v1598_v50 = vand.u32 2147483647, %v1597_v40  ;;  %v1852_v53 = vcvt.f32.s32 %v187_v43 }
  0x5a   :  { %v505_v42 = vmul.f32 0.0472, %v1230_v44  ;;  %v156_v54 = vadd.f32 64.0, %v92_v46  ;;  %v1855_v58 = vand.u32 2147483648, %v187_v43  ;;  %vm2310_vm12 = vcmp.lt.f32.partialorder %v1850_v51, 8388608.0  ;;  %v61_v46 = vld [vmem:[%s2950_s0 + $0x178] sm:$0xff] }
  0x5b   :  { %v346_v55 = vmin.f32 %v282_v48, 255.0  ;;  %v1849_v56 = vsel %vm2288_vm10, %v1848_v49, %v186_v16  ;;  %v1600_v57 = vor.u32 %v1599_v41, %v1598_v50  ;;  %v1853_v60 = vcvt.s32.f32 %v1852_v53 }
  0x5c   :  { %1457 = vmatprep.mubr.msk.f32.mxu1 %vm538_vm4, %v505_v42  ;;  %v314_v59 = vmax.f32 %v1849_v56, 0.0  ;;  %v1602_v61 = vand.u32 2147483647, %v156_v54  ;;  %v1604_v62 = vcvt.f32.s32 %v156_v54  ;;  %v188_v2 = vadd.f32 64.0, %v124_v47 }
  0x5d   :  { %v1199_v63 = vadd.f32 -64.0, %v346_v55  ;;  %v1601_v0 = vsel %vm2301_vm11, %v1600_v57, %v155_v19  ;;  %v1854_v5 = vand.u32 2147483647, %v1853_v60  ;;  %v1607_v6 = vand.u32 2147483648, %v156_v54 }
  0x5e   :  { %v378_v3 = vmin.f32 %v314_v59, 255.0  ;;  %v283_v4 = vmax.f32 %v1601_v0, 0.0  ;;  %vm2317_vm13 = vcmp.lt.f32.partialorder %v1602_v61, 8388608.0  ;;  %v1605_v10 = vcvt.s32.f32 %v1604_v62 }
  0x5f   :  { %v474_v8 = vmul.f32 0.0472, %v1199_v63  ;;  %v1860_v11 = vcvt.f32.s32 %v188_v2  ;;  %v1856_v15 = vor.u32 %v1855_v58, %v1854_v5  ;;  %v1858_v16 = vand.u32 2147483647, %v188_v2 }
  0x60   :  { %v1231_v13 = vadd.f32 -64.0, %v378_v3  ;;  %v347_v14 = vmin.f32 %v283_v4, 255.0  ;;  %v1606_v17 = vand.u32 2147483647, %v1605_v10  ;;  %v1863_v19 = vand.u32 2147483648, %v188_v2 }
  0x61   :  { %1410 = vmatmul.mubr.msk.f32.gmra.mxu0 %vm538_vm4, %v474_v8  ;;  %v1861_v18 = vcvt.s32.f32 %v1860_v11  ;;  %v93_v20 = vmul.f32 21.18644, %v28_v7  ;;  %v1857_v25 = vsel %vm2310_vm12, %v1856_v15, %v187_v43  ;;  %v125_v26 = vmul.f32 21.18644, %v60_v12  ;;  %v62_v11 = vld [vmem:[%s2950_s0 + $0x180] sm:$0xff] }
  0x62   :  { %v506_v23 = vmul.f32 0.0472, %v1231_v13  ;;  %v1200_v24 = vadd.f32 -64.0, %v347_v14  ;;  %v315_v27 = vmax.f32 %v1857_v25, 0.0  ;;  %v1608_v28 = vor.u32 %v1607_v6, %v1606_v17 }
  0x63   :  { %v1862_v29 = vand.u32 2147483647, %v1861_v18  ;;  %v157_v21 = vadd.f32 64.0, %v93_v20  ;;  %vm2331_vm14 = vcmp.lt.f32.partialorder %v1858_v16, 8388608.0  ;;  %v189_v32 = vadd.f32 64.0, %v125_v26  ;;  %v31_v20 = vld [vmem:[%s2950_s0 + $0x88] sm:$0xff] }
  0x64   :  { %1458 = vmatmul.mubr.msk.f32.gmra.mxu1 %vm538_vm4, %v506_v23  ;;  %v475_v30 = vmul.f32 0.0472, %v1200_v24  ;;  %v94_v33 = vmul.f32 21.18644, %v29_v22  ;;  %v379_v34 = vmin.f32 %v315_v27, 255.0  ;;  %v1609_v35 = vsel %vm2317_vm13, %v1608_v28, %v156_v54  ;;  %v30_v54 = vld [vmem:[%s2950_s0 + $0x80] sm:$0xff] }
  0x65   :  { %v1864_v36 = vor.u32 %v1863_v19, %v1862_v29  ;;  %v1610_v37 = vand.u32 2147483647, %v157_v21  ;;  %v284_v38 = vmax.f32 %v1609_v35, 0.0  ;;  %v1612_v39 = vcvt.f32.s32 %v157_v21 }
  0x66   :  { %1412 = vmatprep.mubr.msk.f32.mxu0 %vm538_vm4, %v475_v30  ;;  %v1615_v40 = vand.u32 2147483648, %v157_v21  ;;  %v1232_v41 = vadd.f32 -64.0, %v379_v34  ;;  %v1866_v44 = vand.u32 2147483647, %v189_v32  ;;  %v1868_v45 = vcvt.f32.s32 %v189_v32 }
  0x67   :  { %v1865_v43 = vsel %vm2331_vm14, %v1864_v36, %v188_v2  ;;  %v348_v47 = vmin.f32 %v284_v38, 255.0  ;;  %vm2343_vm15 = vcmp.lt.f32.partialorder %v1610_v37, 8388608.0  ;;  %v1613_v50 = vcvt.s32.f32 %v1612_v39 }
  0x68   :  { %v316_v48 = vmax.f32 %v1865_v43, 0.0  ;;  %v507_v51 = vmul.f32 0.0472, %v1232_v41  ;;  %v1869_v42 = vcvt.s32.f32 %v1868_v45  ;;  %v1871_v52 = vand.u32 2147483648, %v189_v32  ;;  %v63_v41 = vld [vmem:[%s2950_s0 + $0x188] sm:$0xff]  ;;  %v32_v43 = vld [vmem:[%s2950_s0 + $0x90] sm:$0xff] }
  0x69   :  { %v158_v53 = vadd.f32 64.0, %v94_v33  ;;  %v1201_v55 = vadd.f32 -64.0, %v348_v47  ;;  %v1614_v57 = vand.u32 2147483647, %v1613_v50  ;;  %v126_v58 = vmul.f32 21.18644, %v61_v46 }
  0x6a   :  { %v380_v56 = vmin.f32 %v316_v48, 255.0  ;;  %1460 = vmatprep.mubr.msk.f32.mxu1 %vm538_vm4, %v507_v51  ;;  %vm2351_vm0 = vcmp.lt.f32.partialorder %v1866_v44, 8388608.0  ;;  %v1870_v60 = vand.u32 2147483647, %v1869_v42  ;;  %v95_v6 = vmul.f32 21.18644, %v30_v54 }
  0x6b   :  { %v1618_v61 = vand.u32 2147483647, %v158_v53  ;;  %v1620_v62 = vcvt.f32.s32 %v158_v53  ;;  %v476_v63 = vmul.f32 0.0472, %v1201_v55  ;;  %v1616_v1 = vor.u32 %v1615_v40, %v1614_v57  ;;  %v64_v42 = vld [vmem:[%s2950_s0 + $0x190] sm:$0xff] }
  0x6c   :  { %v1233_v0 = vadd.f32 -64.0, %v380_v56  ;;  %v190_v2 = vadd.f32 64.0, %v126_v58  ;;  %v1872_v3 = vor.u32 %v1871_v52, %v1870_v60  ;;  %v1623_v5 = vand.u32 2147483648, %v158_v53 }
  0x6d   :  { %v1621_v4 = vcvt.s32.f32 %v1620_v62  ;;  %1413 = vmatmul.mubr.msk.f32.gmra.mxu0 %vm538_vm4, %v476_v63  ;;  %v1617_v8 = vsel %vm2343_vm15, %v1616_v1, %v157_v21  ;;  %vm2363_vm1 = vcmp.lt.f32.partialorder %v1618_v61, 8388608.0  ;;  %v159_v19 = vadd.f32 64.0, %v95_v6 }
  0x6e   :  { %v508_v7 = vmul.f32 0.0472, %v1233_v0  ;;  %v1874_v9 = vand.u32 2147483647, %v190_v2  ;;  %v1876_v10 = vcvt.f32.s32 %v190_v2  ;;  %v285_v12 = vmax.f32 %v1617_v8, 0.0 }
  0x6f   :  { %v1873_v13 = vsel %vm2351_vm0, %v1872_v3, %v189_v32  ;;  %v1622_v15 = vand.u32 2147483647, %v1621_v4  ;;  %v1879_v18 = vand.u32 2147483648, %v190_v2  ;;  %v127_v25 = vmul.f32 21.18644, %v62_v11 }
  0x70   :  { %1461 = vmatmul.mubr.msk.f32.gmra.mxu1 %vm538_vm4, %v508_v7  ;;  %v317_v16 = vmax.f32 %v1873_v13, 0.0  ;;  %v1877_v17 = vcvt.s32.f32 %v1876_v10  ;;  %v349_v22 = vmin.f32 %v285_v12, 255.0  ;;  %vm2371_vm2 = vcmp.lt.f32.partialorder %v1874_v9, 8388608.0 }
  0x71   :  { %v1624_v23 = vor.u32 %v1623_v5, %v1622_v15  ;;  %v1626_v28 = vand.u32 2147483647, %v159_v19  ;;  %v1628_v29 = vcvt.f32.s32 %v159_v19  ;;  %v191_v31 = vadd.f32 64.0, %v127_v25 }
  0x72   :  { %v381_v26 = vmin.f32 %v317_v16, 255.0  ;;  %v1878_v27 = vand.u32 2147483647, %v1877_v17  ;;  %v1202_v21 = vadd.f32 -64.0, %v349_v22  ;;  %v96_v32 = vmul.f32 21.18644, %v31_v20 }
  0x73   :  { %v1625_v30 = vsel %vm2363_vm1, %v1624_v23, %v158_v53  ;;  %v1631_v36 = vand.u32 2147483648, %v159_v19  ;;  %v1629_v38 = vcvt.s32.f32 %v1628_v29  ;;  %v1882_v39 = vand.u32 2147483647, %v191_v31  ;;  %v33_v20 = vld [vmem:[%s2950_s0 + $0x98] sm:$0xff]  ;;  %v35_v16 = vld [vmem:[%s2950_s0 + $0xa8] sm:$0xff] }
  0x74   :  { %v1234_v33 = vadd.f32 -64.0, %v381_v26  ;;  %v286_v34 = vmax.f32 %v1625_v30, 0.0  ;;  %v1880_v35 = vor.u32 %v1879_v18, %v1878_v27  ;;  %v477_v37 = vmul.f32 0.0472, %v1202_v21 }
  0x75   :  { %v1884_v40 = vcvt.f32.s32 %v191_v31  ;;  %vm2385_vm3 = vcmp.lt.f32.partialorder %v1626_v28, 8388608.0  ;;  %v1630_v49 = vand.u32 2147483647, %v1629_v38  ;;  %v1887_v51 = vand.u32 2147483648, %v191_v31 }
  0x76   :  { %v509_v44 = vmul.f32 0.0472, %v1234_v33  ;;  %v350_v45 = vmin.f32 %v286_v34, 255.0  ;;  %v1881_v46 = vsel %vm2371_vm2, %v1880_v35, %v190_v2  ;;  %1415 = vmatprep.mubr.msk.f32.mxu0 %vm538_vm4, %v477_v37  ;;  %v160_v53 = vadd.f32 64.0, %v96_v32 }
  0x77   :  { %v318_v48 = vmax.f32 %v1881_v46, 0.0  ;;  %v1885_v50 = vcvt.s32.f32 %v1884_v40  ;;  %v128_v54 = vmul.f32 21.18644, %v63_v41  ;;  %v97_v55 = vmul.f32 21.18644, %v32_v43  ;;  %v65_v41 = vld [vmem:[%s2950_s0 + $0x198] sm:$0xff] }
  0x78   :  { %1463 = vmatprep.mubr.msk.f32.mxu1 %vm538_vm4, %v509_v44  ;;  %v1203_v52 = vadd.f32 -64.0, %v350_v45  ;;  %v1632_v57 = vor.u32 %v1631_v36, %v1630_v49  ;;  %vm2394_vm5 = vcmp.lt.f32.partialorder %v1882_v39, 8388608.0  ;;  %v1634_v61 = vand.u32 2147483647, %v160_v53 }
  0x79   :  { %v382_v56 = vmin.f32 %v318_v48, 255.0  ;;  %v1886_v59 = vand.u32 2147483647, %v1885_v50  ;;  %v1636_v62 = vcvt.f32.s32 %v160_v53  ;;  %v129_v63 = vmul.f32 21.18644, %v64_v42 }
  0x7a   :  { %v478_v60 = vmul.f32 0.0472, %v1203_v52  ;;  %v1633_v1 = vsel %vm2385_vm3, %v1632_v57, %v159_v19  ;;  %v192_v3 = vadd.f32 64.0, %v128_v54  ;;  %v1639_v6 = vand.u32 2147483648, %v160_v53 }
  0x7b   :  { %v1235_v0 = vadd.f32 -64.0, %v382_v56  ;;  %v1888_v2 = vor.u32 %v1887_v51, %v1886_v59  ;;  %v287_v4 = vmax.f32 %v1633_v1, 0.0  ;;  %v1637_v5 = vcvt.s32.f32 %v1636_v62  ;;  %v34_v51 = vld [vmem:[%s2950_s0 + $0xa0] sm:$0xff] }
  0x7c   :  { %1416 = vmatmul.mubr.msk.f32.gmra.mxu0 %vm538_vm4, %v478_v60  ;;  %v161_v7 = vadd.f32 64.0, %v97_v55  ;;  %v1890_v10 = vand.u32 2147483647, %v192_v3  ;;  %v1892_v11 = vcvt.f32.s32 %v192_v3  ;;  %vm2403_vm6 = vcmp.lt.f32.partialorder %v1634_v61, 8388608.0  ;;  %v66_v59 = vld [vmem:[%s2950_s0 + $0x1a0] sm:$0xff] }
  0x7d   :  { %v510_v8 = vmul.f32 0.0472, %v1235_v0  ;;  %v1889_v9 = vsel %vm2394_vm5, %v1888_v2, %v191_v31  ;;  %v351_v12 = vmin.f32 %v287_v4, 255.0  ;;  %v1638_v15 = vand.u32 2147483647, %v1637_v5 }
  0x7e   :  { %v319_v13 = vmax.f32 %v1889_v9, 0.0  ;;  %vm2408_vm7 = vcmp.lt.f32.partialorder %v1890_v10, 8388608.0  ;;  %v1893_v17 = vcvt.s32.f32 %v1892_v11  ;;  %v1895_v18 = vand.u32 2147483648, %v192_v3 }
  0x7f   :  { %1464 = vmatmul.mubr.msk.f32.gmra.mxu1 %vm538_vm4, %v510_v8  ;;  %v1644_v19 = vcvt.f32.s32 %v161_v7  ;;  %v1204_v22 = vadd.f32 -64.0, %v351_v12  ;;  %v1640_v24 = vor.u32 %v1639_v6, %v1638_v15  ;;  %v1642_v25 = vand.u32 2147483647, %v161_v7 }
  0x80   :  { %v383_v23 = vmin.f32 %v319_v13, 255.0  ;;  %v1894_v26 = vand.u32 2147483647, %v1893_v17  ;;  %v1647_v28 = vand.u32 2147483648, %v161_v7  ;;  %v193_v29 = vadd.f32 64.0, %v129_v63 }
  0x81   :  { %v1645_v27 = vcvt.s32.f32 %v1644_v19  ;;  %v479_v21 = vmul.f32 0.0472, %v1204_v22  ;;  %v1641_v31 = vsel %vm2403_vm6, %v1640_v24, %v160_v53  ;;  %v98_v32 = vmul.f32 21.18644, %v33_v20 }
  0x82   :  { %v1236_v30 = vadd.f32 -64.0, %v383_v23  ;;  %v288_v33 = vmax.f32 %v1641_v31, 0.0  ;;  %v1896_v34 = vor.u32 %v1895_v18, %v1894_v26  ;;  %v1898_v36 = vand.u32 2147483647, %v193_v29 }
  0x83   :  { %v1646_v35 = vand.u32 2147483647, %v1645_v27  ;;  %1418 = vmatprep.mubr.msk.f32.mxu0 %vm538_vm4, %v479_v21  ;;  %vm2418_vm8 = vcmp.lt.f32.partialorder %v1642_v25, 8388608.0  ;;  %v1900_v39 = vcvt.f32.s32 %v193_v29  ;;  %v162_v40 = vadd.f32 64.0, %v98_v32 }
  0x84   :  { %v511_v37 = vmul.f32 0.0472, %v1236_v30  ;;  %v352_v43 = vmin.f32 %v288_v33, 255.0  ;;  %v1897_v44 = vsel %vm2408_vm7, %v1896_v34, %v192_v3  ;;  %v1903_v46 = vand.u32 2147483648, %v193_v29  ;;  %v37_v3 = vld [vmem:[%s2950_s0 + $0xb8] sm:$0xff] }
  0x85   :  { %v1648_v45 = vor.u32 %v1647_v28, %v1646_v35  ;;  %v320_v47 = vmax.f32 %v1897_v44, 0.0  ;;  %v1901_v48 = vcvt.s32.f32 %v1900_v39  ;;  %v1650_v49 = vand.u32 2147483647, %v162_v40 }
  0x86   :  { %1466 = vmatprep.mubr.msk.f32.mxu1 %vm538_vm4, %v511_v37  ;;  %v1652_v50 = vcvt.f32.s32 %v162_v40  ;;  %v1205_v42 = vadd.f32 -64.0, %v352_v43  ;;  %vm2433_vm9 = vcmp.lt.f32.partialorder %v1898_v36, 8388608.0  ;;  %v130_v54 = vmul.f32 21.18644, %v65_v41  ;;  %v67_v37 = vld [vmem:[%s2950_s0 + $0x1a8] sm:$0xff] }
  0x87   :  { %v1649_v52 = vsel %vm2418_vm8, %v1648_v45, %v161_v7  ;;  %v384_v55 = vmin.f32 %v320_v47, 255.0  ;;  %v1902_v57 = vand.u32 2147483647, %v1901_v48  ;;  %v1655_v58 = vand.u32 2147483648, %v162_v40  ;;  %v36_v47 = vld [vmem:[%s2950_s0 + $0xb0] sm:$0xff] }
  0x88   :  { %v289_v56 = vmax.f32 %v1649_v52, 0.0  ;;  %v480_v60 = vmul.f32 0.0472, %v1205_v42  ;;  %v1653_v61 = vcvt.s32.f32 %v1652_v50  ;;  %v194_v62 = vadd.f32 64.0, %v130_v54  ;;  %v68_v48 = vld [vmem:[%s2950_s0 + $0x1b0] sm:$0xff] }
  0x89   :  { %v99_v63 = vmul.f32 21.18644, %v34_v51  ;;  %v1237_v0 = vadd.f32 -64.0, %v384_v55  ;;  %v1904_v2 = vor.u32 %v1903_v46, %v1902_v57  ;;  %vm2440_vm10 = vcmp.lt.f32.partialorder %v1650_v49, 8388608.0 }
  0x8a   :  { %v353_v1 = vmin.f32 %v289_v56, 255.0  ;;  %1419 = vmatmul.mubr.msk.f32.gmra.mxu0 %vm538_vm4, %v480_v60  ;;  %v1654_v4 = vand.u32 2147483647, %v1653_v61  ;;  %v1906_v5 = vand.u32 2147483647, %v194_v62  ;;  %v1908_v6 = vcvt.f32.s32 %v194_v62 }
  0x8b   :  { %v131_v7 = vmul.f32 21.18644, %v66_v59  ;;  %v512_v8 = vmul.f32 0.0472, %v1237_v0  ;;  %v1905_v10 = vsel %vm2433_vm9, %v1904_v2, %v193_v29  ;;  %v163_v11 = vadd.f32 64.0, %v99_v63 }
  0x8c   :  { %v1206_v9 = vadd.f32 -64.0, %v353_v1  ;;  %v321_v12 = vmax.f32 %v1905_v10, 0.0  ;;  %v1656_v13 = vor.u32 %v1655_v58, %v1654_v4  ;;  %v1909_v14 = vcvt.s32.f32 %v1908_v6 }
  0x8d   :  { %v1911_v15 = vand.u32 2147483648, %v194_v62  ;;  %1467 = vmatmul.mubr.msk.f32.gmra.mxu1 %vm538_vm4, %v512_v8  ;;  %vm2451_vm11 = vcmp.lt.f32.partialorder %v1906_v5, 8388608.0  ;;  %v1658_v19 = vand.u32 2147483647, %v163_v11  ;;  %v1660_v20 = vcvt.f32.s32 %v163_v11 }
  0x8e   :  { %v481_v17 = vmul.f32 0.0472, %v1206_v9  ;;  %v385_v22 = vmin.f32 %v321_v12, 255.0  ;;  %v1657_v23 = vsel %vm2440_vm10, %v1656_v13, %v162_v40  ;;  %v1910_v24 = vand.u32 2147483647, %v1909_v14 }
  0x8f   :  { %v195_v25 = vadd.f32 64.0, %v131_v7  ;;  %v290_v26 = vmax.f32 %v1657_v23, 0.0  ;;  %v1661_v27 = vcvt.s32.f32 %v1660_v20  ;;  %v1663_v28 = vand.u32 2147483648, %v163_v11 }
  0x90   :  { %1421 = vmatprep.mubr.msk.f32.mxu0 %vm538_vm4, %v481_v17  ;;  %v100_v29 = vmul.f32 21.18644, %v35_v16  ;;  %v1238_v21 = vadd.f32 -64.0, %v385_v22  ;;  %v1912_v30 = vor.u32 %v1911_v15, %v1910_v24  ;;  %vm2458_vm12 = vcmp.lt.f32.partialorder %v1658_v19, 8388608.0 }
  0x91   :  { %v1914_v31 = vand.u32 2147483647, %v195_v25  ;;  %v1916_v32 = vcvt.f32.s32 %v195_v25  ;;  %v354_v33 = vmin.f32 %v290_v26, 255.0  ;;  %v1662_v35 = vand.u32 2147483647, %v1661_v27 }
  0x92   :  { %v164_v36 = vadd.f32 64.0, %v100_v29  ;;  %v513_v38 = vmul.f32 0.0472, %v1238_v21  ;;  %v1913_v39 = vsel %vm2451_vm11, %v1912_v30, %v194_v62  ;;  %v1919_v41 = vand.u32 2147483648, %v195_v25  ;;  %v69_v29 = vld [vmem:[%s2950_s0 + $0x1b8] sm:$0xff]  ;;  %v38_v21 = vld [vmem:[%s2950_s0 + $0xc0] sm:$0xff] }
  0x93   :  { %v1917_v40 = vcvt.s32.f32 %v1916_v32  ;;  %v1207_v43 = vadd.f32 -64.0, %v354_v33  ;;  %v322_v44 = vmax.f32 %v1913_v39, 0.0  ;;  %v1664_v45 = vor.u32 %v1663_v28, %v1662_v35 }
  0x94   :  { %vm2467_vm13 = vcmp.lt.f32.partialorder %v1914_v31, 8388608.0  ;;  %1469 = vmatprep.mubr.msk.f32.mxu1 %vm538_vm4, %v513_v38  ;;  %v1666_v50 = vand.u32 2147483647, %v164_v36  ;;  %v1668_v51 = vcvt.f32.s32 %v164_v36  ;;  %v132_v42 = vmul.f32 21.18644, %v67_v37 }
  0x95   :  { %v1918_v49 = vand.u32 2147483647, %v1917_v40  ;;  %v482_v52 = vmul.f32 0.0472, %v1207_v43  ;;  %v386_v53 = vmin.f32 %v322_v44, 255.0  ;;  %v1665_v54 = vsel %vm2458_vm12, %v1664_v45, %v163_v11 }
  0x96   :  { %v1671_v55 = vand.u32 2147483648, %v164_v36  ;;  %v291_v56 = vmax.f32 %v1665_v54, 0.0  ;;  %v1669_v58 = vcvt.s32.f32 %v1668_v51  ;;  %v196_v59 = vadd.f32 64.0, %v132_v42 }
  0x97   :  { %v1920_v57 = vor.u32 %v1919_v41, %v1918_v49  ;;  %1422 = vmatmul.mubr.msk.f32.gmra.mxu0 %vm538_vm4, %v482_v52  ;;  %v1239_v60 = vadd.f32 -64.0, %v386_v53  ;;  %v101_v61 = vmul.f32 21.18644, %v36_v47  ;;  %v133_v62 = vmul.f32 21.18644, %v68_v48 }
  0x98   :  { %v355_v63 = vmin.f32 %v291_v56, 255.0  ;;  %vm2483_vm14 = vcmp.lt.f32.partialorder %v1666_v50, 8388608.0  ;;  %v1670_v2 = vand.u32 2147483647, %v1669_v58  ;;  %v1922_v6 = vand.u32 2147483647, %v196_v59 }
  0x99   :  { %v1921_v0 = vsel %vm2467_vm13, %v1920_v57, %v195_v25  ;;  %v514_v4 = vmul.f32 0.0472, %v1239_v60  ;;  %v1924_v7 = vcvt.f32.s32 %v196_v59  ;;  %v1927_v10 = vand.u32 2147483648, %v196_v59 }
  0x9a   :  { %v323_v5 = vmax.f32 %v1921_v0, 0.0  ;;  %v1208_v8 = vadd.f32 -64.0, %v355_v63  ;;  %v1672_v9 = vor.u32 %v1671_v55, %v1670_v2  ;;  %v165_v11 = vadd.f32 64.0, %v101_v61  ;;  %v70_v2 = vld [vmem:[%s2950_s0 + $0x1c0] sm:$0xff] }
  0x9b   :  { %1470 = vmatmul.mubr.msk.f32.gmra.mxu1 %vm538_vm4, %v514_v4  ;;  %v1925_v13 = vcvt.s32.f32 %v1924_v7  ;;  %v197_v14 = vadd.f32 64.0, %v133_v62  ;;  %v102_v15 = vmul.f32 21.18644, %v37_v3  ;;  %vm2493_vm15 = vcmp.lt.f32.partialorder %v1922_v6, 8388608.0  ;;  %v39_v7 = vld [vmem:[%s2950_s0 + $0xc8] sm:$0xff] }
  0x9c   :  { %v387_v12 = vmin.f32 %v323_v5, 255.0  ;;  %v483_v16 = vmul.f32 0.0472, %v1208_v8  ;;  %v1673_v17 = vsel %vm2483_vm14, %v1672_v9, %v164_v36  ;;  %v1674_v18 = vand.u32 2147483647, %v165_v11 }
  0x9d   :  { %v1676_v19 = vcvt.f32.s32 %v165_v11  ;;  %v292_v22 = vmax.f32 %v1673_v17, 0.0  ;;  %v1926_v24 = vand.u32 2147483647, %v1925_v13  ;;  %v1679_v27 = vand.u32 2147483648, %v165_v11 }
  0x9e   :  { %v1240_v20 = vadd.f32 -64.0, %v387_v12  ;;  %1424 = vmatprep.mubr.msk.f32.mxu0 %vm538_vm4, %v483_v16  ;;  %vm2498_vm0 = vcmp.lt.f32.partialorder %v1674_v18, 8388608.0  ;;  %v1932_v28 = vcvt.f32.s32 %v197_v14  ;;  %v1930_v33 = vand.u32 2147483647, %v197_v14  ;;  %v71_v16 = vld [vmem:[%s2950_s0 + $0x1c8] sm:$0xff] }
  0x9f   :  { %v1677_v26 = vcvt.s32.f32 %v1676_v19  ;;  %v356_v31 = vmin.f32 %v292_v22, 255.0  ;;  %v1928_v32 = vor.u32 %v1927_v10, %v1926_v24  ;;  %v1935_v36 = vand.u32 2147483648, %v197_v14 }
  0xa0   :  { %v515_v30 = vmul.f32 0.0472, %v1240_v20  ;;  %v1933_v35 = vcvt.s32.f32 %v1932_v28  ;;  %v166_v37 = vadd.f32 64.0, %v102_v15  ;;  %v134_v40 = vmul.f32 21.18644, %v69_v29 }
  0xa1   :  { %v1678_v34 = vand.u32 2147483647, %v1677_v26  ;;  %v1209_v38 = vadd.f32 -64.0, %v356_v31  ;;  %v1929_v39 = vsel %vm2493_vm15, %v1928_v32, %v196_v59  ;;  %v103_v41 = vmul.f32 21.18644, %v38_v21 }
  0xa2   :  { %1472 = vmatprep.mubr.msk.f32.mxu1 %vm538_vm4, %v515_v30  ;;  %v324_v43 = vmax.f32 %v1929_v39, 0.0  ;;  %v1934_v45 = vand.u32 2147483647, %v1933_v35  ;;  %v1682_v46 = vand.u32 2147483647, %v166_v37  ;;  %vm2511_vm1 = vcmp.lt.f32.partialorder %v1930_v33, 8388608.0 }
  0xa3   :  { %v1680_v44 = vor.u32 %v1679_v27, %v1678_v34  ;;  %v484_v47 = vmul.f32 0.0472, %v1209_v38  ;;  %v1684_v49 = vcvt.f32.s32 %v166_v37  ;;  %v198_v50 = vadd.f32 64.0, %v134_v40  ;;  %v40_v40 = vld [vmem:[%s2950_s0 + $0xd0] sm:$0xff] }
  0xa4   :  { %v388_v51 = vmin.f32 %v324_v43, 255.0  ;;  %v1936_v52 = vor.u32 %v1935_v36, %v1934_v45  ;;  %v1687_v53 = vand.u32 2147483648, %v166_v37  ;;  %vm2520_vm2 = vcmp.lt.f32.partialorder %v1682_v46, 8388608.0 }
  0xa5   :  { %v1681_v42 = vsel %vm2498_vm0, %v1680_v44, %v165_v11  ;;  %1425 = vmatmul.mubr.msk.f32.gmra.mxu0 %vm538_vm4, %v484_v47  ;;  %v1685_v55 = vcvt.s32.f32 %v1684_v49  ;;  %v1938_v56 = vand.u32 2147483647, %v198_v50  ;;  %v1940_v57 = vcvt.f32.s32 %v198_v50 }
  0xa6   :  { %v293_v54 = vmax.f32 %v1681_v42, 0.0  ;;  %v1241_v58 = vadd.f32 -64.0, %v388_v51  ;;  %v1937_v59 = vsel %vm2511_vm1, %v1936_v52, %v197_v14  ;;  %v167_v61 = vadd.f32 64.0, %v103_v41 }
  0xa7   :  { %v325_v63 = vmax.f32 %v1937_v59, 0.0  ;;  %v1686_v0 = vand.u32 2147483647, %v1685_v55  ;;  %v1943_v1 = vand.u32 2147483648, %v198_v50  ;;  %vm2527_vm3 = vcmp.lt.f32.partialorder %v1938_v56, 8388608.0 }
  0xa8   :  { %v357_v62 = vmin.f32 %v293_v54, 255.0  ;;  %v516_v3 = vmul.f32 0.0472, %v1241_v58  ;;  %v1941_v5 = vcvt.s32.f32 %v1940_v57  ;;  %v1692_v6 = vcvt.f32.s32 %v167_v61 }
  0xa9   :  { %v389_v9 = vmin.f32 %v325_v63, 255.0  ;;  %v1688_v10 = vor.u32 %v1687_v53, %v1686_v0  ;;  %v1690_v11 = vand.u32 2147483647, %v167_v61  ;;  %v1695_v14 = vand.u32 2147483648, %v167_v61 }
  0xaa   :  { %v1210_v8 = vadd.f32 -64.0, %v357_v62  ;;  %1473 = vmatmul.mubr.msk.f32.gmra.mxu1 %vm538_vm4, %v516_v3  ;;  %v1942_v12 = vand.u32 2147483647, %v1941_v5  ;;  %v1693_v13 = vcvt.s32.f32 %v1692_v6  ;;  %v135_v15 = vmul.f32 21.18644, %v70_v2  ;;  %v41_v6 = vld [vmem:[%s2950_s0 + $0xd8] sm:$0xff] }
  0xab   :  { %v1242_v18 = vadd.f32 -64.0, %v389_v9  ;;  %v1689_v19 = vsel %vm2520_vm2, %v1688_v10, %v166_v37  ;;  %v104_v20 = vmul.f32 21.18644, %v39_v7  ;;  %vm2541_vm5 = vcmp.lt.f32.partialorder %v1690_v11, 8388608.0 }
  0xac   :  { %v485_v17 = vmul.f32 0.0472, %v1210_v8  ;;  %v294_v22 = vmax.f32 %v1689_v19, 0.0  ;;  %v1944_v23 = vor.u32 %v1943_v1, %v1942_v12  ;;  %v1694_v24 = vand.u32 2147483647, %v1693_v13 }
  0xad   :  { %v199_v25 = vadd.f32 64.0, %v135_v15  ;;  %v517_v26 = vmul.f32 0.0472, %v1242_v18  ;;  %v168_v28 = vadd.f32 64.0, %v104_v20  ;;  %v136_v29 = vmul.f32 21.18644, %v71_v16 }
  0xae   :  { %1427 = vmatprep.mubr.msk.f32.mxu0 %vm538_vm4, %v485_v17  ;;  %v358_v21 = vmin.f32 %v294_v22, 255.0  ;;  %v1945_v30 = vsel %vm2527_vm3, %v1944_v23, %v198_v50  ;;  %v1696_v31 = vor.u32 %v1695_v14, %v1694_v24  ;;  %v72_v50 = vld [vmem:[%s2950_s0 + $0x1d0] sm:$0xff]  ;;  %v105_v53 = vmul.f32 21.18644, %v40_v40  ;;  %v73_v15 = vld [vmem:[%s2950_s0 + $0x1d8] sm:$0xff] }
  0xaf   :  { %v1946_v32 = vand.u32 2147483647, %v199_v25  ;;  %1475 = vmatprep.mubr.msk.f32.mxu1 %vm538_vm4, %v517_v26  ;;  %v326_v33 = vmax.f32 %v1945_v30, 0.0  ;;  %v1948_v34 = vcvt.f32.s32 %v199_v25  ;;  %v1951_v35 = vand.u32 2147483648, %v199_v25 }
  0xb0   :  { %v1211_v36 = vadd.f32 -64.0, %v358_v21  ;;  %v1697_v37 = vsel %vm2541_vm5, %v1696_v31, %v167_v61  ;;  %v1698_v38 = vand.u32 2147483647, %v168_v28  ;;  %v1700_v39 = vcvt.f32.s32 %v168_v28 }
  0xb1   :  { %v390_v41 = vmin.f32 %v326_v33, 255.0  ;;  %v295_v43 = vmax.f32 %v1697_v37, 0.0  ;;  %vm2553_vm6 = vcmp.lt.f32.partialorder %v1946_v32, 8388608.0  ;;  %v1949_v45 = vcvt.s32.f32 %v1948_v34  ;;  %v74_v37 = vld [vmem:[%s2950_s0 + $0x1e0] sm:$0xff] }
  0xb2   :  { %v486_v46 = vmul.f32 0.0472, %v1211_v36  ;;  %v1701_v47 = vcvt.s32.f32 %v1700_v39  ;;  %v1703_v48 = vand.u32 2147483648, %v168_v28  ;;  %v200_v49 = vadd.f32 64.0, %v136_v29  ;;  %v42_v36 = vld [vmem:[%s2950_s0 + $0xe0] sm:$0xff] }
  0xb3   :  { %v1243_v51 = vadd.f32 -64.0, %v390_v41  ;;  %v359_v42 = vmin.f32 %v295_v43, 255.0  ;;  %v1950_v52 = vand.u32 2147483647, %v1949_v45  ;;  %vm2561_vm7 = vcmp.lt.f32.partialorder %v1698_v38, 8388608.0 }
  0xb4   :  { %1428 = vmatmul.mubr.msk.f32.gmra.mxu0 %vm538_vm4, %v486_v46  ;;  %v1702_v55 = vand.u32 2147483647, %v1701_v47  ;;  %v1954_v56 = vand.u32 2147483647, %v200_v49  ;;  %v1956_v57 = vcvt.f32.s32 %v200_v49  ;;  %v169_v61 = vadd.f32 64.0, %v105_v53  ;;  %v43_v47 = vld [vmem:[%s2950_s0 + $0xe8] sm:$0xff] }
  0xb5   :  { %v518_v58 = vmul.f32 0.0472, %v1243_v51  ;;  %v1212_v59 = vadd.f32 -64.0, %v359_v42  ;;  %v1952_v60 = vor.u32 %v1951_v35, %v1950_v52  ;;  %v1959_v0 = vand.u32 2147483648, %v200_v49 }
  0xb6   :  { %v1704_v62 = vor.u32 %v1703_v48, %v1702_v55  ;;  %v1957_v63 = vcvt.s32.f32 %v1956_v57  ;;  %v137_v1 = vmul.f32 21.18644, %v72_v50  ;;  %v1706_v4 = vand.u32 2147483647, %v169_v61 }
  0xb7   :  { %1476 = vmatmul.mubr.msk.f32.gmra.mxu1 %vm538_vm4, %v518_v58  ;;  %v487_v2 = vmul.f32 0.0472, %v1212_v59  ;;  %v1953_v3 = vsel %vm2553_vm6, %v1952_v60, %v199_v25  ;;  %v1708_v5 = vcvt.f32.s32 %v169_v61  ;;  %vm2573_vm8 = vcmp.lt.f32.partialorder %v1954_v56, 8388608.0 }
  0xb8   :  { %v327_v7 = vmax.f32 %v1953_v3, 0.0  ;;  %v1705_v8 = vsel %vm2561_vm7, %v1704_v62, %v168_v28  ;;  %v1958_v10 = vand.u32 2147483647, %v1957_v63  ;;  %v1711_v13 = vand.u32 2147483648, %v169_v61 }
  0xb9   :  { %1430 = vmatprep.mubr.msk.f32.mxu0 %vm538_vm4, %v487_v2  ;;  %v296_v11 = vmax.f32 %v1705_v8, 0.0  ;;  %v1709_v12 = vcvt.s32.f32 %v1708_v5  ;;  %v201_v14 = vadd.f32 64.0, %v137_v1  ;;  %vm2581_vm9 = vcmp.lt.f32.partialorder %v1706_v4, 8388608.0 }
  0xba   :  { %v391_v16 = vmin.f32 %v327_v7, 255.0  ;;  %v1960_v17 = vor.u32 %v1959_v0, %v1958_v10  ;;  %v106_v19 = vmul.f32 21.18644, %v41_v6  ;;  %v138_v28 = vmul.f32 21.18644, %v73_v15  ;;  %v75_v15 = vld [vmem:[%s2950_s0 + $0x1e8] sm:$0xff] }
  0xbb   :  { %v360_v20 = vmin.f32 %v296_v11, 255.0  ;;  %v1710_v22 = vand.u32 2147483647, %v1709_v12  ;;  %v1962_v23 = vand.u32 2147483647, %v201_v14  ;;  %v1964_v24 = vcvt.f32.s32 %v201_v14  ;;  %v77_v11 = vld [vmem:[%s2950_s0 + $0x1f8] sm:$0xff] }
  0xbc   :  { %v1244_v25 = vadd.f32 -64.0, %v391_v16  ;;  %v1961_v26 = vsel %vm2573_vm8, %v1960_v17, %v200_v49  ;;  %v170_v27 = vadd.f32 64.0, %v106_v19  ;;  %v1967_v31 = vand.u32 2147483648, %v201_v14 }
  0xbd   :  { %v1213_v29 = vadd.f32 -64.0, %v360_v20  ;;  %v328_v21 = vmax.f32 %v1961_v26, 0.0  ;;  %v1712_v30 = vor.u32 %v1711_v13, %v1710_v22  ;;  %v1965_v33 = vcvt.s32.f32 %v1964_v24 }
  0xbe   :  { %v519_v32 = vmul.f32 0.0472, %v1244_v25  ;;  %v1714_v34 = vand.u32 2147483647, %v170_v27  ;;  %v1716_v35 = vcvt.f32.s32 %v170_v27  ;;  %vm2595_vm10 = vcmp.lt.f32.partialorder %v1962_v23, 8388608.0 }
  0xbf   :  { %v488_v38 = vmul.f32 0.0472, %v1213_v29  ;;  %v392_v39 = vmin.f32 %v328_v21, 255.0  ;;  %v1713_v40 = vsel %vm2581_vm9, %v1712_v30, %v169_v61  ;;  %v1966_v44 = vand.u32 2147483647, %v1965_v33 }
  0xc0   :  { %1478 = vmatprep.mubr.msk.f32.mxu1 %vm538_vm4, %v519_v32  ;;  %v297_v43 = vmax.f32 %v1713_v40, 0.0  ;;  %v1717_v45 = vcvt.s32.f32 %v1716_v35  ;;  %v1719_v46 = vand.u32 2147483648, %v170_v27  ;;  %v202_v49 = vadd.f32 64.0, %v138_v28 }
  0xc1   :  { %1431 = vmatmul.mubr.msk.f32.gmra.mxu0 %vm538_vm4, %v488_v38  ;;  %v1245_v48 = vadd.f32 -64.0, %v392_v39  ;;  %v107_v50 = vmul.f32 21.18644, %v42_v36  ;;  %v139_v51 = vmul.f32 21.18644, %v74_v37  ;;  %v1968_v52 = vor.u32 %v1967_v31, %v1966_v44  ;;  %v44_v36 = vld [vmem:[%s2950_s0 + $0xf0] sm:$0xff] }
  0xc2   :  { %v361_v42 = vmin.f32 %v297_v43, 255.0  ;;  %vm2604_vm11 = vcmp.lt.f32.partialorder %v1714_v34, 8388608.0  ;;  %v1718_v54 = vand.u32 2147483647, %v1717_v45  ;;  %v1970_v56 = vand.u32 2147483647, %v202_v49 }
  0xc3   :  { %v520_v55 = vmul.f32 0.0472, %v1245_v48  ;;  %v1972_v57 = vcvt.f32.s32 %v202_v49  ;;  %v108_v58 = vmul.f32 21.18644, %v43_v47  ;;  %v1969_v60 = vsel %vm2595_vm10, %v1968_v52, %v201_v14 }
  0xc4   :  { %v1214_v59 = vadd.f32 -64.0, %v361_v42  ;;  %v1720_v61 = vor.u32 %v1719_v46, %v1718_v54  ;;  %v171_v62 = vadd.f32 64.0, %v107_v50  ;;  %v329_v63 = vmax.f32 %v1969_v60, 0.0  ;;  %v76_v46 = vld [vmem:[%s2950_s0 + $0x1f0] sm:$0xff]  ;;  %v45_v54 = vld [vmem:[%s2950_s0 + $0xf8] sm:$0xff] }
  0xc5   :  { %1479 = vmatmul.mubr.msk.f32.gmra.mxu1 %vm538_vm4, %v520_v55  ;;  %v1973_v0 = vcvt.s32.f32 %v1972_v57  ;;  %v1975_v1 = vand.u32 2147483648, %v202_v49  ;;  %v203_v2 = vadd.f32 64.0, %v139_v51  ;;  %vm2613_vm12 = vcmp.lt.f32.partialorder %v1970_v56, 8388608.0 }
  0xc6   :  { %v489_v3 = vmul.f32 0.0472, %v1214_v59  ;;  %v1721_v4 = vsel %vm2604_vm11, %v1720_v61, %v170_v27  ;;  %v1722_v5 = vand.u32 2147483647, %v171_v62  ;;  %v1724_v6 = vcvt.f32.s32 %v171_v62 }
  0xc7   :  { %v393_v7 = vmin.f32 %v329_v63, 255.0  ;;  %v298_v8 = vmax.f32 %v1721_v4, 0.0  ;;  %v1974_v10 = vand.u32 2147483647, %v1973_v0  ;;  %v1727_v13 = vand.u32 2147483648, %v171_v62 }
  0xc8   :  { %1433 = vmatprep.mubr.msk.f32.mxu0 %vm538_vm4, %v489_v3  ;;  %vm2618_vm13 = vcmp.lt.f32.partialorder %v1722_v5, 8388608.0  ;;  %v1725_v12 = vcvt.s32.f32 %v1724_v6  ;;  %v1980_v14 = vcvt.f32.s32 %v203_v2  ;;  %v1978_v19 = vand.u32 2147483647, %v203_v2 }
  0xc9   :  { %v1246_v16 = vadd.f32 -64.0, %v393_v7  ;;  %v362_v17 = vmin.f32 %v298_v8, 255.0  ;;  %v1976_v18 = vor.u32 %v1975_v1, %v1974_v10  ;;  %v1983_v23 = vand.u32 2147483648, %v203_v2 }
  0xca   :  { %v1726_v20 = vand.u32 2147483647, %v1725_v12  ;;  %v1981_v22 = vcvt.s32.f32 %v1980_v14  ;;  %v172_v24 = vadd.f32 64.0, %v108_v58  ;;  %v140_v28 = vmul.f32 21.18644, %v75_v15 }
  0xcb   :  { %v521_v25 = vmul.f32 0.0472, %v1246_v16  ;;  %v1215_v26 = vadd.f32 -64.0, %v362_v17  ;;  %v1977_v27 = vsel %vm2613_vm12, %v1976_v18, %v202_v49  ;;  %vm2628_vm14 = vcmp.lt.f32.partialorder %v1978_v19, 8388608.0 }
  0xcc   :  { %v330_v29 = vmax.f32 %v1977_v27, 0.0  ;;  %v1728_v21 = vor.u32 %v1727_v13, %v1726_v20  ;;  %v1982_v30 = vand.u32 2147483647, %v1981_v22  ;;  %v1730_v31 = vand.u32 2147483647, %v172_v24 }
  0xcd   :  { %1481 = vmatprep.mubr.msk.f32.mxu1 %vm538_vm4, %v521_v25  ;;  %v490_v32 = vmul.f32 0.0472, %v1215_v26  ;;  %v1732_v34 = vcvt.f32.s32 %v172_v24  ;;  %v204_v35 = vadd.f32 64.0, %v140_v28  ;;  %v1735_v40 = vand.u32 2147483648, %v172_v24 }
  0xce   :  { %v394_v37 = vmin.f32 %v330_v29, 255.0  ;;  %v1729_v38 = vsel %vm2618_vm13, %v1728_v21, %v171_v62  ;;  %v1984_v39 = vor.u32 %v1983_v23, %v1982_v30  ;;  %vm2643_vm15 = vcmp.lt.f32.partialorder %v1730_v31, 8388608.0  ;;  %v2671_v21 = vld [vmem:[%s2951_s2] ss:$0 sm:$0xff] }
  0xcf   :  { %1434 = vmatmul.mubr.msk.f32.gmra.mxu0 %vm538_vm4, %v490_v32  ;;  %v299_v41 = vmax.f32 %v1729_v38, 0.0  ;;  %v1733_v43 = vcvt.s32.f32 %v1732_v34  ;;  %v1986_v44 = vand.u32 2147483647, %v204_v35  ;;  %v1988_v45 = vcvt.f32.s32 %v204_v35 }
  0xd0   :  { %v1247_v47 = vadd.f32 -64.0, %v394_v37  ;;  %v1985_v48 = vsel %vm2628_vm14, %v1984_v39, %v203_v2  ;;  %v109_v50 = vmul.f32 21.18644, %v44_v36  ;;  %v1991_v53 = vand.u32 2147483648, %v204_v35 }
  0xd1   :  { %v363_v51 = vmin.f32 %v299_v41, 255.0  ;;  %v331_v42 = vmax.f32 %v1985_v48, 0.0  ;;  %v1734_v52 = vand.u32 2147483647, %v1733_v43  ;;  %v1989_v56 = vcvt.s32.f32 %v1988_v45 }
  0xd2   :  { %v522_v55 = vmul.f32 0.0472, %v1247_v47  ;;  %v173_v57 = vadd.f32 64.0, %v109_v50  ;;  %v141_v58 = vmul.f32 21.18644, %v76_v46  ;;  %vm2650_vm0 = vcmp.lt.f32.partialorder %v1986_v44, 8388608.0 }
  0xd3   :  { %v1216_v59 = vadd.f32 -64.0, %v363_v51  ;;  %v395_v60 = vmin.f32 %v331_v42, 255.0  ;;  %v1736_v61 = vor.u32 %v1735_v40, %v1734_v52  ;;  %v1990_v63 = vand.u32 2147483647, %v1989_v56 }
  0xd4   :  { %1482 = vmatmul.mubr.msk.f32.gmra.mxu1 %vm538_vm4, %v522_v55  ;;  %v1738_v0 = vand.u32 2147483647, %v173_v57  ;;  %v1740_v1 = vcvt.f32.s32 %v173_v57  ;;  %v110_v2 = vmul.f32 21.18644, %v45_v54  ;;  %v205_v6 = vadd.f32 64.0, %v141_v58 }
  0xd5   :  { %v491_v3 = vmul.f32 0.0472, %v1216_v59  ;;  %v1248_v4 = vadd.f32 -64.0, %v395_v60  ;;  %v1737_v5 = vsel %vm2643_vm15, %v1736_v61, %v172_v24  ;;  %v1992_v8 = vor.u32 %v1991_v53, %v1990_v63 }
  0xd6   :  { %v300_v7 = vmax.f32 %v1737_v5, 0.0  ;;  %v1741_v9 = vcvt.s32.f32 %v1740_v1  ;;  %v1743_v10 = vand.u32 2147483648, %v173_v57  ;;  %vm2661_vm1 = vcmp.lt.f32.partialorder %v1738_v0, 8388608.0 }
  0xd7   :  { %1436 = vmatprep.mubr.msk.f32.mxu0 %vm538_vm4, %v491_v3  ;;  %v523_v12 = vmul.f32 0.0472, %v1248_v4  ;;  %v1994_v14 = vand.u32 2147483647, %v205_v6  ;;  %v1996_v15 = vcvt.f32.s32 %v205_v6  ;;  %v1993_v17 = vsel %vm2650_vm0, %v1992_v8, %v204_v35 }
  0xd8   :  { %v364_v16 = vmin.f32 %v300_v7, 255.0  ;;  %v1742_v18 = vand.u32 2147483647, %v1741_v9  ;;  %v174_v19 = vadd.f32 64.0, %v110_v2  ;;  %v332_v20 = vmax.f32 %v1993_v17, 0.0 }
  0xd9   :  { %1484 = vmatprep.mubr.msk.f32.mxu1 %vm538_vm4, %v523_v12  ;;  %v1997_v22 = vcvt.s32.f32 %v1996_v15  ;;  %v1999_v23 = vand.u32 2147483648, %v205_v6  ;;  %v142_v24 = vmul.f32 21.18644, %v77_v11  ;;  %v1396_v29 = vpop.f32.mrf.mxu0  ;;  %vm2673_vm2 = vcmp.lt.f32.partialorder %v1994_v14, 8388608.0 }
  0xda   :  { %v1217_v25 = vadd.f32 -64.0, %v364_v16  ;;  %v1744_v26 = vor.u32 %v1743_v10, %v1742_v18  ;;  %v1746_v27 = vand.u32 2147483647, %v174_v19  ;;  %v1748_v28 = vcvt.f32.s32 %v174_v19 }
  0xdb   :  { %v396_v30 = vmin.f32 %v332_v20, 255.0  ;;  %v1998_v32 = vand.u32 2147483647, %v1997_v22  ;;  %v206_v33 = vadd.f32 64.0, %v142_v24  ;;  %v1751_v38 = vand.u32 2147483648, %v174_v19  ;;  %v801_v48 = vpop.f32.mrf.mxu0 }
  0xdc   :  { %v1444_v34 = vpop.f32.mrf.mxu1  ;;  %v492_v35 = vmul.f32 0.0472, %v1217_v25  ;;  %v1745_v36 = vsel %vm2661_vm1, %v1744_v26, %v173_v57  ;;  %v1749_v37 = vcvt.s32.f32 %v1748_v28  ;;  %vm2679_vm3 = vcmp.lt.f32.partialorder %v1746_v27, 8388608.0 }
  0xdd   :  { %v1249_v39 = vadd.f32 -64.0, %v396_v30  ;;  %v301_v40 = vmax.f32 %v1745_v36, 0.0  ;;  %v2000_v41 = vor.u32 %v1999_v23, %v1998_v32  ;;  %v2002_v45 = vand.u32 2147483647, %v206_v33 }
  0xde   :  { %1437 = vmatmul.mubr.msk.f32.gmra.mxu0 %vm538_vm4, %v492_v35  ;;  %v1750_v44 = vand.u32 2147483647, %v1749_v37  ;;  %v2004_v46 = vcvt.f32.s32 %v206_v33  ;;  %v807_v47 = vadd.f32 %v1396_v29, %v2671_v21  ;;  %v961_v49 = vpop.f32.mrf.mxu1  ;;  %v2007_v52 = vand.u32 2147483648, %v206_v33 }
  0xdf   :  { %v524_v50 = vmul.f32 0.0472, %v1249_v39  ;;  %v365_v51 = vmin.f32 %v301_v40, 255.0  ;;  %v2001_v42 = vsel %vm2673_vm2, %v2000_v41, %v205_v6  ;;  %v967_v56 = vadd.f32 %v1444_v34, %v2671_v21 }
  0xe0   :  { %v333_v53 = vmax.f32 %v2001_v42, 0.0  ;;  %v1752_v54 = vor.u32 %v1751_v38, %v1750_v44  ;;  %v2005_v55 = vcvt.s32.f32 %v2004_v46  ;;  %1121 = vst [vmem:[%s2952_s3 + $0x8] sm:$0xff] %v807_v47  ;;  %v802_v58 = vadd.f32 %v2671_v21, %v801_v48 }
  0xe1   :  { %1485 = vmatmul.mubr.msk.f32.gmra.mxu1 %vm538_vm4, %v524_v50  ;;  %v1218_v57 = vadd.f32 -64.0, %v365_v51  ;;  %v962_v59 = vadd.f32 %v2671_v21, %v961_v49  ;;  %1153 = vst [vmem:[%s2952_s3 + $0x108] sm:$0xff] %v967_v56  ;;  %vm2003_vm5 = vcmp.lt.f32.partialorder %v2002_v45, 8388608.0 }
  0xe2   :  { %v397_v60 = vmin.f32 %v333_v53, 255.0  ;;  %v1753_v61 = vsel %vm2679_vm3, %v1752_v54, %v174_v19  ;;  %v2006_v62 = vand.u32 2147483647, %v2005_v55  ;;  %1120 = vst [vmem:[%s2952_s3] sm:$0xff] %v802_v58 }
  0xe3   :  { %v493_v63 = vmul.f32 0.0472, %v1218_v57  ;;  %v302_v0 = vmax.f32 %v1753_v61, 0.0  ;;  %1152 = vst [vmem:[%s2952_s3 + $0x100] sm:$0xff] %v962_v59 }
  0xe4   :  { %v1250_v1 = vadd.f32 -64.0, %v397_v60  ;;  %v2008_v2 = vor.u32 %v2007_v52, %v2006_v62 }
  0xe5   :  { %1439 = vmatprep.mubr.msk.f32.mxu0 %vm538_vm4, %v493_v63  ;;  %v366_v3 = vmin.f32 %v302_v0, 255.0 }
  0xe6   :  { %v525_v4 = vmul.f32 0.0472, %v1250_v1  ;;  %v2009_v5 = vsel %vm2003_vm5, %v2008_v2, %v206_v33 }
  0xe7   :  { %v1219_v6 = vadd.f32 -64.0, %v366_v3  ;;  %v334_v7 = vmax.f32 %v2009_v5, 0.0 }
  0xe8   :  { %v1399_v8 = vpop.f32.mrf.mxu0  ;;  %1487 = vmatprep.mubr.msk.f32.mxu1 %vm538_vm4, %v525_v4 }
  0xe9   :  { %v817_v9 = vadd.f32 %v1399_v8, %v2671_v21  ;;  %v494_v10 = vmul.f32 0.0472, %v1219_v6  ;;  %v398_v11 = vmin.f32 %v334_v7, 255.0 }
  0xea   :  { %v811_v12 = vpop.f32.mrf.mxu0 }
  0xeb   :  { %1123 = vst [vmem:[%s2952_s3 + $0x18] sm:$0xff] %v817_v9  ;;  %v812_v13 = vadd.f32 %v2671_v21, %v811_v12  ;;  %1440 = vmatmul.mubr.msk.f32.gmra.mxu0 %vm538_vm4, %v494_v10  ;;  %v1251_v14 = vadd.f32 -64.0, %v398_v11 }
  0xec   :  { %v1447_v15 = vpop.f32.mrf.mxu1 }
  0xed   :  { %v977_v16 = vadd.f32 %v1447_v15, %v2671_v21  ;;  %1122 = vst [vmem:[%s2952_s3 + $0x10] sm:$0xff] %v812_v13  ;;  %v526_v17 = vmul.f32 0.0472, %v1251_v14 }
  0xee   :  { %v971_v18 = vpop.f32.mrf.mxu1 }
  0xef   :  { %1155 = vst [vmem:[%s2952_s3 + $0x118] sm:$0xff] %v977_v16  ;;  %v972_v19 = vadd.f32 %v2671_v21, %v971_v18  ;;  %1488 = vmatmul.mubr.msk.f32.gmra.mxu1 %vm538_vm4, %v526_v17 }
  0xf1   :  { %1154 = vst [vmem:[%s2952_s3 + $0x110] sm:$0xff] %v972_v19 }
  0xf8   :  { %v1402_v20 = vpop.f32.mrf.mxu0 }
  0xf9   :  { %v827_v22 = vadd.f32 %v1402_v20, %v2671_v21 }
  0xfa   :  { %v1450_v23 = vpop.f32.mrf.mxu1  ;;  %v821_v24 = vpop.f32.mrf.mxu0 }
  0xfb   :  { %1125 = vst [vmem:[%s2952_s3 + $0x28] sm:$0xff] %v827_v22  ;;  %v987_v25 = vadd.f32 %v1450_v23, %v2671_v21  ;;  %v822_v26 = vadd.f32 %v2671_v21, %v821_v24 }
  0xfc   :  { %v981_v27 = vpop.f32.mrf.mxu1 }
  0xfd   :  { %1157 = vst [vmem:[%s2952_s3 + $0x128] sm:$0xff] %v987_v25  ;;  %1124 = vst [vmem:[%s2952_s3 + $0x20] sm:$0xff] %v822_v26  ;;  %v982_v28 = vadd.f32 %v2671_v21, %v981_v27 }
  0xff   :  { %1156 = vst [vmem:[%s2952_s3 + $0x120] sm:$0xff] %v982_v28 }
 0x104   :  { %v1405_v29 = vpop.f32.mrf.mxu0 }
 0x105   :  { %v837_v30 = vadd.f32 %v1405_v29, %v2671_v21 }
 0x106   :  { %v1453_v31 = vpop.f32.mrf.mxu1  ;;  %v831_v32 = vpop.f32.mrf.mxu0 }
 0x107   :  { %1127 = vst [vmem:[%s2952_s3 + $0x38] sm:$0xff] %v837_v30  ;;  %v997_v33 = vadd.f32 %v1453_v31, %v2671_v21  ;;  %v832_v34 = vadd.f32 %v2671_v21, %v831_v32 }
 0x108   :  { %v991_v35 = vpop.f32.mrf.mxu1 }
 0x109   :  { %1159 = vst [vmem:[%s2952_s3 + $0x138] sm:$0xff] %v997_v33  ;;  %1126 = vst [vmem:[%s2952_s3 + $0x30] sm:$0xff] %v832_v34  ;;  %v992_v36 = vadd.f32 %v2671_v21, %v991_v35 }
 0x10b   :  { %1158 = vst [vmem:[%s2952_s3 + $0x130] sm:$0xff] %v992_v36 }
 0x112   :  { %v1408_v37 = vpop.f32.mrf.mxu0 }
 0x113   :  { %v847_v38 = vadd.f32 %v1408_v37, %v2671_v21 }
 0x114   :  { %v841_v39 = vpop.f32.mrf.mxu0 }
 0x115   :  { %1129 = vst [vmem:[%s2952_s3 + $0x48] sm:$0xff] %v847_v38  ;;  %v1456_v40 = vpop.f32.mrf.mxu1  ;;  %v842_v41 = vadd.f32 %v2671_v21, %v841_v39 }
 0x116   :  { %v1007_v43 = vadd.f32 %v1456_v40, %v2671_v21 }
 0x117   :  { %1128 = vst [vmem:[%s2952_s3 + $0x40] sm:$0xff] %v842_v41  ;;  %v1001_v44 = vpop.f32.mrf.mxu1 }
 0x118   :  { %1161 = vst [vmem:[%s2952_s3 + $0x148] sm:$0xff] %v1007_v43  ;;  %v1002_v45 = vadd.f32 %v2671_v21, %v1001_v44 }
 0x11a   :  { %1160 = vst [vmem:[%s2952_s3 + $0x140] sm:$0xff] %v1002_v45 }
 0x121   :  { %v1411_v46 = vpop.f32.mrf.mxu0 }
 0x122   :  { %v857_v47 = vadd.f32 %v1411_v46, %v2671_v21 }
 0x123   :  { %v851_v48 = vpop.f32.mrf.mxu0 }
 0x124   :  { %1131 = vst [vmem:[%s2952_s3 + $0x58] sm:$0xff] %v857_v47  ;;  %v1459_v49 = vpop.f32.mrf.mxu1  ;;  %v852_v50 = vadd.f32 %v2671_v21, %v851_v48 }
 0x125   :  { %v1017_v51 = vadd.f32 %v1459_v49, %v2671_v21 }
 0x126   :  { %1130 = vst [vmem:[%s2952_s3 + $0x50] sm:$0xff] %v852_v50  ;;  %v1011_v42 = vpop.f32.mrf.mxu1 }
 0x127   :  { %1163 = vst [vmem:[%s2952_s3 + $0x158] sm:$0xff] %v1017_v51  ;;  %v1012_v52 = vadd.f32 %v2671_v21, %v1011_v42 }
 0x129   :  { %1162 = vst [vmem:[%s2952_s3 + $0x150] sm:$0xff] %v1012_v52 }
 0x12d   :  { %v1414_v53 = vpop.f32.mrf.mxu0 }
 0x12e   :  { %v867_v54 = vadd.f32 %v1414_v53, %v2671_v21 }
 0x12f   :  { %v861_v56 = vpop.f32.mrf.mxu0 }
 0x130   :  { %v1462_v55 = vpop.f32.mrf.mxu1  ;;  %1133 = vst [vmem:[%s2952_s3 + $0x68] sm:$0xff] %v867_v54  ;;  %v862_v58 = vadd.f32 %v2671_v21, %v861_v56 }
 0x131   :  { %v1027_v57 = vadd.f32 %v1462_v55, %v2671_v21 }
 0x132   :  { %v1021_v59 = vpop.f32.mrf.mxu1  ;;  %1132 = vst [vmem:[%s2952_s3 + $0x60] sm:$0xff] %v862_v58 }
 0x133   :  { %1165 = vst [vmem:[%s2952_s3 + $0x168] sm:$0xff] %v1027_v57  ;;  %v1022_v60 = vadd.f32 %v2671_v21, %v1021_v59 }
 0x135   :  { %1164 = vst [vmem:[%s2952_s3 + $0x160] sm:$0xff] %v1022_v60 }
 0x13c   :  { %v1417_v61 = vpop.f32.mrf.mxu0 }
 0x13d   :  { %v877_v62 = vadd.f32 %v1417_v61, %v2671_v21 }
 0x13e   :  { %v871_v63 = vpop.f32.mrf.mxu0 }
 0x13f   :  { %1135 = vst [vmem:[%s2952_s3 + $0x78] sm:$0xff] %v877_v62  ;;  %v1465_v0 = vpop.f32.mrf.mxu1  ;;  %v872_v1 = vadd.f32 %v2671_v21, %v871_v63 }
 0x140   :  { %v1037_v2 = vadd.f32 %v1465_v0, %v2671_v21 }
 0x141   :  { %1134 = vst [vmem:[%s2952_s3 + $0x70] sm:$0xff] %v872_v1  ;;  %v1031_v3 = vpop.f32.mrf.mxu1 }
 0x142   :  { %1167 = vst [vmem:[%s2952_s3 + $0x178] sm:$0xff] %v1037_v2  ;;  %v1032_v4 = vadd.f32 %v2671_v21, %v1031_v3 }
 0x144   :  { %1166 = vst [vmem:[%s2952_s3 + $0x170] sm:$0xff] %v1032_v4 }
 0x14a   :  { %v1420_v5 = vpop.f32.mrf.mxu0 }
 0x14b   :  { %v887_v6 = vadd.f32 %v1420_v5, %v2671_v21 }
 0x14c   :  { %v881_v7 = vpop.f32.mrf.mxu0 }
 0x14d   :  { %1137 = vst [vmem:[%s2952_s3 + $0x88] sm:$0xff] %v887_v6  ;;  %v1468_v8 = vpop.f32.mrf.mxu1  ;;  %v882_v9 = vadd.f32 %v2671_v21, %v881_v7 }
 0x14e   :  { %v1047_v10 = vadd.f32 %v1468_v8, %v2671_v21 }
 0x14f   :  { %1136 = vst [vmem:[%s2952_s3 + $0x80] sm:$0xff] %v882_v9  ;;  %v1041_v11 = vpop.f32.mrf.mxu1 }
 0x150   :  { %1169 = vst [vmem:[%s2952_s3 + $0x188] sm:$0xff] %v1047_v10  ;;  %v1042_v12 = vadd.f32 %v2671_v21, %v1041_v11 }
 0x152   :  { %1168 = vst [vmem:[%s2952_s3 + $0x180] sm:$0xff] %v1042_v12 }
 0x157   :  { %v1423_v13 = vpop.f32.mrf.mxu0 }
 0x158   :  { %v897_v14 = vadd.f32 %v1423_v13, %v2671_v21 }
 0x159   :  { %v891_v15 = vpop.f32.mrf.mxu0 }
 0x15a   :  { %1139 = vst [vmem:[%s2952_s3 + $0x98] sm:$0xff] %v897_v14  ;;  %v892_v16 = vadd.f32 %v2671_v21, %v891_v15 }
 0x15b   :  { %v1471_v17 = vpop.f32.mrf.mxu1 }
 0x15c   :  { %v1057_v18 = vadd.f32 %v1471_v17, %v2671_v21  ;;  %1138 = vst [vmem:[%s2952_s3 + $0x90] sm:$0xff] %v892_v16 }
 0x15d   :  { %v1051_v19 = vpop.f32.mrf.mxu1 }
 0x15e   :  { %1171 = vst [vmem:[%s2952_s3 + $0x198] sm:$0xff] %v1057_v18  ;;  %v1052_v20 = vadd.f32 %v2671_v21, %v1051_v19 }
 0x160   :  { %1170 = vst [vmem:[%s2952_s3 + $0x190] sm:$0xff] %v1052_v20 }
 0x165   :  { %v1426_v22 = vpop.f32.mrf.mxu0 }
 0x166   :  { %v907_v23 = vadd.f32 %v1426_v22, %v2671_v21 }
 0x167   :  { %v901_v24 = vpop.f32.mrf.mxu0 }
 0x168   :  { %1141 = vst [vmem:[%s2952_s3 + $0xa8] sm:$0xff] %v907_v23  ;;  %v902_v25 = vadd.f32 %v2671_v21, %v901_v24 }
 0x16a   :  { %v1474_v26 = vpop.f32.mrf.mxu1  ;;  %1140 = vst [vmem:[%s2952_s3 + $0xa0] sm:$0xff] %v902_v25 }
 0x16b   :  { %v1067_v27 = vadd.f32 %v1474_v26, %v2671_v21 }
 0x16c   :  { %v1061_v28 = vpop.f32.mrf.mxu1 }
 0x16d   :  { %1173 = vst [vmem:[%s2952_s3 + $0x1a8] sm:$0xff] %v1067_v27  ;;  %v1062_v29 = vadd.f32 %v2671_v21, %v1061_v28 }
 0x16f   :  { %1172 = vst [vmem:[%s2952_s3 + $0x1a0] sm:$0xff] %v1062_v29 }
 0x174   :  { %v1429_v30 = vpop.f32.mrf.mxu0 }
 0x175   :  { %v917_v31 = vadd.f32 %v1429_v30, %v2671_v21 }
 0x176   :  { %v911_v32 = vpop.f32.mrf.mxu0 }
 0x177   :  { %1143 = vst [vmem:[%s2952_s3 + $0xb8] sm:$0xff] %v917_v31  ;;  %v1477_v33 = vpop.f32.mrf.mxu1  ;;  %v912_v34 = vadd.f32 %v2671_v21, %v911_v32 }
 0x178   :  { %v1077_v35 = vadd.f32 %v1477_v33, %v2671_v21 }
 0x179   :  { %1142 = vst [vmem:[%s2952_s3 + $0xb0] sm:$0xff] %v912_v34  ;;  %v1071_v36 = vpop.f32.mrf.mxu1 }
 0x17a   :  { %1175 = vst [vmem:[%s2952_s3 + $0x1b8] sm:$0xff] %v1077_v35  ;;  %v1072_v37 = vadd.f32 %v2671_v21, %v1071_v36 }
 0x17c   :  { %1174 = vst [vmem:[%s2952_s3 + $0x1b0] sm:$0xff] %v1072_v37 }
 0x181   :  { %v1432_v38 = vpop.f32.mrf.mxu0 }
 0x182   :  { %v927_v39 = vadd.f32 %v1432_v38, %v2671_v21 }
 0x183   :  { %v921_v40 = vpop.f32.mrf.mxu0 }
 0x184   :  { %1145 = vst [vmem:[%s2952_s3 + $0xc8] sm:$0xff] %v927_v39  ;;  %v922_v41 = vadd.f32 %v2671_v21, %v921_v40 }
 0x185   :  { %v1480_v43 = vpop.f32.mrf.mxu1 }
 0x186   :  { %v1087_v44 = vadd.f32 %v1480_v43, %v2671_v21  ;;  %1144 = vst [vmem:[%s2952_s3 + $0xc0] sm:$0xff] %v922_v41 }
 0x187   :  { %v1081_v45 = vpop.f32.mrf.mxu1 }
 0x188   :  { %1177 = vst [vmem:[%s2952_s3 + $0x1c8] sm:$0xff] %v1087_v44  ;;  %v1082_v46 = vadd.f32 %v2671_v21, %v1081_v45 }
 0x18a   :  { %1176 = vst [vmem:[%s2952_s3 + $0x1c0] sm:$0xff] %v1082_v46 }
 0x18f   :  { %v1435_v47 = vpop.f32.mrf.mxu0 }
 0x190   :  { %v937_v48 = vadd.f32 %v1435_v47, %v2671_v21 }
 0x191   :  { %v931_v49 = vpop.f32.mrf.mxu0 }
 0x192   :  { %1147 = vst [vmem:[%s2952_s3 + $0xd8] sm:$0xff] %v937_v48  ;;  %v932_v50 = vadd.f32 %v2671_v21, %v931_v49 }
 0x194   :  { %v1483_v51 = vpop.f32.mrf.mxu1  ;;  %1146 = vst [vmem:[%s2952_s3 + $0xd0] sm:$0xff] %v932_v50 }
 0x195   :  { %v1097_v42 = vadd.f32 %v1483_v51, %v2671_v21 }
 0x196   :  { %v1091_v52 = vpop.f32.mrf.mxu1 }
 0x197   :  { %1179 = vst [vmem:[%s2952_s3 + $0x1d8] sm:$0xff] %v1097_v42  ;;  %v1092_v53 = vadd.f32 %v2671_v21, %v1091_v52 }
 0x199   :  { %1178 = vst [vmem:[%s2952_s3 + $0x1d0] sm:$0xff] %v1092_v53 }
 0x19e   :  { %v1438_v54 = vpop.f32.mrf.mxu0 }
 0x19f   :  { %v947_v55 = vadd.f32 %v1438_v54, %v2671_v21 }
 0x1a0   :  { %v941_v56 = vpop.f32.mrf.mxu0 }
 0x1a1   :  { %1149 = vst [vmem:[%s2952_s3 + $0xe8] sm:$0xff] %v947_v55  ;;  %v1486_v57 = vpop.f32.mrf.mxu1  ;;  %v942_v58 = vadd.f32 %v2671_v21, %v941_v56 }
 0x1a2   :  { %v1107_v59 = vadd.f32 %v1486_v57, %v2671_v21 }
 0x1a3   :  { %1148 = vst [vmem:[%s2952_s3 + $0xe0] sm:$0xff] %v942_v58  ;;  %v1101_v60 = vpop.f32.mrf.mxu1 }
 0x1a4   :  { %1181 = vst [vmem:[%s2952_s3 + $0x1e8] sm:$0xff] %v1107_v59  ;;  %v1102_v61 = vadd.f32 %v2671_v21, %v1101_v60 }
 0x1a6   :  { %1180 = vst [vmem:[%s2952_s3 + $0x1e0] sm:$0xff] %v1102_v61 }
 0x1ab   :  { %v1441_v62 = vpop.f32.mrf.mxu0 }
 0x1ac   :  { %v957_v63 = vadd.f32 %v1441_v62, %v2671_v21 }
 0x1ad   :  { %v951_v0 = vpop.f32.mrf.mxu0 }
 0x1ae   :  { %1151 = vst [vmem:[%s2952_s3 + $0xf8] sm:$0xff] %v957_v63  ;;  %v952_v1 = vadd.f32 %v2671_v21, %v951_v0 }
 0x1af   :  { %v1489_v2 = vpop.f32.mrf.mxu1 }
 0x1b0   :  { %v1117_v3 = vadd.f32 %v1489_v2, %v2671_v21  ;;  %1150 = vst [vmem:[%s2952_s3 + $0xf0] sm:$0xff] %v952_v1 }
 0x1b1   :  { %v1111_v4 = vpop.f32.mrf.mxu1 }
 0x1b2   :  { %1183 = vst [vmem:[%s2952_s3 + $0x1f8] sm:$0xff] %v1117_v3  ;;  %v1112_v5 = vadd.f32 %v2671_v21, %v1111_v4 }
 0x1b4   :  { %1182 = vst [vmem:[%s2952_s3 + $0x1f0] sm:$0xff] %v1112_v5 }

</bundles_post_ra>
